<compile_context>
chip_gen: v6e
topology: v6e:2x2x1
jax: 0.10.0
libtpu: 0.0.40
codegen_flags: <defaults>
</compile_context>

<pallas_src>
import functools

import jax
import jax.numpy as jnp
from jax import lax
from jax.experimental import pallas as pl
from jax.experimental.pallas import tpu as pltpu


def _round_up(x, m):
    return ((x + m - 1) // m) * m


def bilstm_fused_kernel(ids_ref,                       # (B_BLK, T)   int32
                        tf_ref, tb_ref,                # (Vpad, 4H)   f32 each
                        whh_ref,                       # (H, 4H)      f32
                        wclsf_ref, wclsb_ref,          # (H, 2)       f32 each
                        bcls_ref,                      # (1, 2)       f32
                        out_ref,                       # (B_BLK, 2)   f32
                        *, hidden_dim, seq_len):
    H = hidden_dim
    T = seq_len
    B = out_ref.shape[0]
    Vpad = tf_ref.shape[0]

    ids = ids_ref[...]                                            # (B, T)
    # One iota, hoisted out of the loop (broadcast_in_dim is not CSE'd by JAX).
    iota_v = lax.broadcasted_iota(jnp.int32, (B, Vpad), 1)        # (B, Vpad)

    tf = tf_ref[...]                                              # (Vpad, 4H)
    whh = whh_ref[...]                                            # (H, 4H)

    def onehot(t):
        # Static lane slice (B, 1) broadcast against (B, Vpad).  Padded vocab
        # rows are never selected (ids < V).
        return (ids[:, t:t + 1] == iota_v).astype(jnp.float32)

    h = jnp.zeros((B, H), jnp.float32)
    c = jnp.zeros((B, H), jnp.float32)

    # Forward recurrence, fully unrolled (T is small and static).  Per step:
    # one lane-dense input-projection matmul (independent of h -> overlappable)
    # and ONE packed recurrent matmul, then static 32-lane gate slices.
    for t in range(T):
        z = (jnp.dot(onehot(t), tf, preferred_element_type=jnp.float32)
             + jnp.dot(h, whh, preferred_element_type=jnp.float32))   # (B, 4H)
        i = jax.nn.sigmoid(z[:, 0:H])
        f = jax.nn.sigmoid(z[:, H:2 * H])
        g = jnp.tanh(z[:, 2 * H:3 * H])
        o = jax.nn.sigmoid(z[:, 3 * H:4 * H])
        c = f * c + i * g
        h = o * jnp.tanh(c)

    # Backward direction: only its first processed step (t = T-1), zero state.
    # Forget gate drops out because c0 = 0.
    zb = jnp.dot(onehot(T - 1), tb_ref[...], preferred_element_type=jnp.float32)
    ib = jax.nn.sigmoid(zb[:, 0:H])
    gb = jnp.tanh(zb[:, 2 * H:3 * H])
    ob = jax.nn.sigmoid(zb[:, 3 * H:4 * H])
    h_bwd = ob * jnp.tanh(ib * gb)

    # Classifier without the [h_fwd, h_bwd] lane concat: W_cls split in halves.
    logits = (jnp.dot(h, wclsf_ref[...], preferred_element_type=jnp.float32)
              + jnp.dot(h_bwd, wclsb_ref[...], preferred_element_type=jnp.float32)
              + bcls_ref[...])
    out_ref[...] = logits.astype(out_ref.dtype)


def init_params(key, vocab_size, embedding_dim, hidden_dim):
    """Deterministic synthetic parameters with PyTorch-style shapes."""
    H = hidden_dim
    keys = jax.random.split(key, 12)
    bound = 1.0 / jnp.sqrt(jnp.float32(H))

    def uni(k, shape):
        return jax.random.uniform(k, shape, jnp.float32, -bound, bound)

    return {
        "embedding": jax.random.normal(keys[0], (vocab_size, embedding_dim),
                                       jnp.float32),
        # forward direction (PyTorch shapes: weight_ih (4H, E), weight_hh (4H, H))
        "w_ih_f": uni(keys[1], (4 * H, embedding_dim)),
        "w_hh_f": uni(keys[2], (4 * H, H)),
        "b_ih_f": uni(keys[3], (4 * H,)),
        "b_hh_f": uni(keys[4], (4 * H,)),
        # backward direction
        "w_ih_b": uni(keys[5], (4 * H, embedding_dim)),
        "w_hh_b": uni(keys[6], (4 * H, H)),
        "b_ih_b": uni(keys[7], (4 * H,)),
        "b_hh_b": uni(keys[8], (4 * H,)),
        # classifier: Linear(2H -> 2)
        "w_cls": uni(keys[9], (2, 2 * H)),
        "b_cls": uni(keys[10], (2,)),
    }


def prepare_params(params, hidden_dim):
    """One-time packing (outside the jitted forward): fold the embedding into the
    LSTM input projections and lay every weight out lane-dense for the kernel."""
    H = hidden_dim
    V, _ = params["embedding"].shape
    Vpad = _round_up(V, 128)
    emb = params["embedding"]

    # Embedding ∘ input-projection fused per direction:
    #   gin[b,t] = emb[ids[b,t]] @ W_ih^T + (b_ih + b_hh)  ==  table[ids[b,t]]
    b_f = params["b_ih_f"] + params["b_hh_f"]
    b_b = params["b_ih_b"] + params["b_hh_b"]
    table_f = emb @ params["w_ih_f"].T + b_f                     # (V, 4H)
    table_b = emb @ params["w_ih_b"].T + b_b                     # (V, 4H)
    table_f = jnp.pad(table_f, ((0, Vpad - V), (0, 0)))          # (Vpad, 4H)
    table_b = jnp.pad(table_b, ((0, Vpad - V), (0, 0)))

    wcls_t = params["w_cls"].T                                   # (2H, 2)
    return {
        "table_f": table_f,
        "table_b": table_b,
        "whh": params["w_hh_f"].T,                               # (H, 4H) packed
        "wcls_f": wcls_t[:H],                                    # (H, 2)
        "wcls_b": wcls_t[H:],                                    # (H, 2)
        "bcls": params["b_cls"].reshape(1, 2),
    }


@functools.partial(jax.jit, static_argnames=("hidden_dim",))
def model_forward(inputs, prep, hidden_dim):
    H = hidden_dim
    B, T = inputs.shape
    Vpad, G = prep["table_f"].shape                              # G = 4H

    # Batch block: whole (8-padded) batch up to 256 rows per block; beyond that,
    # 256-row blocks so the "parallel" grid axis has >= 2 blocks to shard across
    # v7x's two TensorCores.  Per-block VMEM stays « 1 MiB on all generations.
    B8 = _round_up(max(B, 1), 8)
    if B8 <= 256:
        B_BLK = B8
        B_pad = B8
    else:
        B_BLK = 256
        B_pad = _round_up(B, 256)

    ids = inputs.astype(jnp.int32)
    if B_pad != B:
        ids = jnp.pad(ids, ((0, B_pad - B), (0, 0)))             # pad rows: token 0

    kernel = functools.partial(bilstm_fused_kernel, hidden_dim=H, seq_len=T)

    out = pl.pallas_call(
        kernel,
        out_shape=jax.ShapeDtypeStruct((B_pad, 2), jnp.float32),
        grid_spec=pltpu.PrefetchScalarGridSpec(
            num_scalar_prefetch=0,
            grid=(B_pad // B_BLK,),
            in_specs=[
                pl.BlockSpec((B_BLK, T), lambda b: (b, 0)),      # ids
                pl.BlockSpec((Vpad, G), lambda b: (0, 0)),       # table_f
                pl.BlockSpec((Vpad, G), lambda b: (0, 0)),       # table_b
                pl.BlockSpec((H, G), lambda b: (0, 0)),          # w_hh packed
                pl.BlockSpec((H, 2), lambda b: (0, 0)),          # w_cls fwd half
                pl.BlockSpec((H, 2), lambda b: (0, 0)),          # w_cls bwd half
                pl.BlockSpec((1, 2), lambda b: (0, 0)),          # b_cls
            ],
            out_specs=pl.BlockSpec((B_BLK, 2), lambda b: (b, 0)),
        ),
        compiler_params=pltpu.CompilerParams(
            dimension_semantics=("parallel",)),
    )(ids, prep["table_f"], prep["table_b"], prep["whh"],
      prep["wcls_f"], prep["wcls_b"], prep["bcls"])

    return out[:B]


if __name__ == "__main__":
    VOCAB = 100
    EMB = 32
    HIDDEN = 32
    BATCH = 2
    SEQ = 8

    key = jax.random.PRNGKey(0)
    pkey, ikey = jax.random.split(key)
    params = init_params(pkey, VOCAB, EMB, HIDDEN)
    prep = prepare_params(params, HIDDEN)
    inputs = jax.random.randint(ikey, (BATCH, SEQ), 0, VOCAB, dtype=jnp.int32)

    logits = model_forward(inputs, prep, HIDDEN)
    jax.block_until_ready(logits)

    assert logits.shape == (BATCH, 2)
    assert bool(jnp.all(jnp.isfinite(logits)))
    print("KERNEL_OK")
</pallas_src>

<mosaic_0001>
module attributes {stable_mosaic.version = 11 : i64} {
  func.func @bilstm_fused_kernel(%arg0: i32, %arg1: memref<8x8xi32, #tpu.memory_space<vmem>>, %arg2: memref<128x128xf32, #tpu.memory_space<vmem>>, %arg3: memref<128x128xf32, #tpu.memory_space<vmem>>, %arg4: memref<32x128xf32, #tpu.memory_space<vmem>>, %arg5: memref<32x2xf32, #tpu.memory_space<vmem>>, %arg6: memref<32x2xf32, #tpu.memory_space<vmem>>, %arg7: memref<1x2xf32, #tpu.memory_space<vmem>>, %arg8: memref<8x2xf32, #tpu.memory_space<vmem>>) attributes {dimension_semantics = [#tpu.dimension_semantics<parallel>], iteration_bounds = array<i64: 1>, scalar_prefetch = 0 : i64, scratch_operands = 0 : i64, tpu.core_type = #tpu.core_type<tc>, window_params = [{transform_indices = @transform_0, window_bounds = array<i64: 8, 8>}, {pipeline_mode = #tpu.pipeline_mode<synchronous>, transform_indices = @transform_1, window_bounds = array<i64: 128, 128>}, {pipeline_mode = #tpu.pipeline_mode<synchronous>, transform_indices = @transform_2, window_bounds = array<i64: 128, 128>}, {pipeline_mode = #tpu.pipeline_mode<synchronous>, transform_indices = @transform_3, window_bounds = array<i64: 32, 128>}, {pipeline_mode = #tpu.pipeline_mode<synchronous>, transform_indices = @transform_4, window_bounds = array<i64: 32, 2>}, {pipeline_mode = #tpu.pipeline_mode<synchronous>, transform_indices = @transform_5, window_bounds = array<i64: 32, 2>}, {pipeline_mode = #tpu.pipeline_mode<synchronous>, transform_indices = @transform_6, window_bounds = array<i64: 1, 2>}, {transform_indices = @transform_7, window_bounds = array<i64: 8, 2>}]} {
    %c0 = arith.constant 0 : index
    %c0_0 = arith.constant 0 : index
    %0 = vector.load %arg1[%c0, %c0_0] : memref<8x8xi32, #tpu.memory_space<vmem>>, vector<8x8xi32>
    %1 = tpu.iota {dimensions = array<i32: 1>} : vector<8x128xi32>
    %c0_1 = arith.constant 0 : index
    %c0_2 = arith.constant 0 : index
    %2 = vector.load %arg2[%c0_1, %c0_2] : memref<128x128xf32, #tpu.memory_space<vmem>>, vector<128x128xf32>
    %c0_3 = arith.constant 0 : index
    %c0_4 = arith.constant 0 : index
    %3 = vector.load %arg4[%c0_3, %c0_4] : memref<32x128xf32, #tpu.memory_space<vmem>>, vector<32x128xf32>
    %cst = arith.constant 0.000000e+00 : f32
    %4 = vector.broadcast %cst : f32 to vector<8x32xf32>
    %cst_5 = arith.constant 0.000000e+00 : f32
    %5 = vector.broadcast %cst_5 : f32 to vector<8x32xf32>
    %6 = vector.extract_strided_slice %0 {offsets = [0, 0], sizes = [8, 1], strides = [1, 1]} : vector<8x8xi32> to vector<8x1xi32>
    %7 = vector.broadcast %6 : vector<8x1xi32> to vector<8x128xi32>
    %8 = arith.cmpi eq, %7, %1 : vector<8x128xi32>
    %9 = arith.extui %8 : vector<8x128xi1> to vector<8x128xi32>
    %10 = arith.sitofp %9 : vector<8x128xi32> to vector<8x128xf32>
    %cst_6 = arith.constant dense<0.000000e+00> : vector<8x128xf32>
    %11 = tpu.matmul %10, %2, %cst_6 {dimension_numbers = #tpu.dot_dimension_numbers<[1], [0], [0], [1], [0, 0, 1, 1], [], []>} : vector<8x128xf32>, vector<128x128xf32>, vector<8x128xf32> -> vector<8x128xf32>
    %cst_7 = arith.constant dense<0.000000e+00> : vector<8x128xf32>
    %12 = tpu.matmul %4, %3, %cst_7 {dimension_numbers = #tpu.dot_dimension_numbers<[1], [0], [0], [1], [0, 0, 1, 1], [], []>} : vector<8x32xf32>, vector<32x128xf32>, vector<8x128xf32> -> vector<8x128xf32>
    %13 = arith.addf %11, %12 : vector<8x128xf32>
    %14 = vector.extract_strided_slice %13 {offsets = [0, 0], sizes = [8, 32], strides = [1, 1]} : vector<8x128xf32> to vector<8x32xf32>
    %15 = arith.negf %14 : vector<8x32xf32>
    %16 = math.exp %15 : vector<8x32xf32>
    %cst_8 = arith.constant 1.000000e+00 : f32
    %17 = vector.broadcast %cst_8 : f32 to vector<8x32xf32>
    %18 = arith.addf %17, %16 : vector<8x32xf32>
    %19 = arith.divf %17, %18 : vector<8x32xf32>
    %20 = vector.extract_strided_slice %13 {offsets = [0, 32], sizes = [8, 32], strides = [1, 1]} : vector<8x128xf32> to vector<8x32xf32>
    %21 = arith.negf %20 : vector<8x32xf32>
    %22 = math.exp %21 : vector<8x32xf32>
    %cst_9 = arith.constant 1.000000e+00 : f32
    %23 = vector.broadcast %cst_9 : f32 to vector<8x32xf32>
    %24 = arith.addf %23, %22 : vector<8x32xf32>
    %25 = arith.divf %23, %24 : vector<8x32xf32>
    %26 = vector.extract_strided_slice %13 {offsets = [0, 64], sizes = [8, 32], strides = [1, 1]} : vector<8x128xf32> to vector<8x32xf32>
    %27 = math.tanh %26 : vector<8x32xf32>
    %28 = vector.extract_strided_slice %13 {offsets = [0, 96], sizes = [8, 32], strides = [1, 1]} : vector<8x128xf32> to vector<8x32xf32>
    %29 = arith.negf %28 : vector<8x32xf32>
    %30 = math.exp %29 : vector<8x32xf32>
    %cst_10 = arith.constant 1.000000e+00 : f32
    %31 = vector.broadcast %cst_10 : f32 to vector<8x32xf32>
    %32 = arith.addf %31, %30 : vector<8x32xf32>
    %33 = arith.divf %31, %32 : vector<8x32xf32>
    %34 = arith.mulf %25, %5 : vector<8x32xf32>
    %35 = arith.mulf %19, %27 : vector<8x32xf32>
    %36 = arith.addf %34, %35 : vector<8x32xf32>
    %37 = math.tanh %36 : vector<8x32xf32>
    %38 = arith.mulf %33, %37 : vector<8x32xf32>
    %39 = vector.extract_strided_slice %0 {offsets = [0, 1], sizes = [8, 1], strides = [1, 1]} : vector<8x8xi32> to vector<8x1xi32>
    %40 = vector.broadcast %39 : vector<8x1xi32> to vector<8x128xi32>
    %41 = arith.cmpi eq, %40, %1 : vector<8x128xi32>
    %42 = arith.extui %41 : vector<8x128xi1> to vector<8x128xi32>
    %43 = arith.sitofp %42 : vector<8x128xi32> to vector<8x128xf32>
    %cst_11 = arith.constant dense<0.000000e+00> : vector<8x128xf32>
    %44 = tpu.matmul %43, %2, %cst_11 {dimension_numbers = #tpu.dot_dimension_numbers<[1], [0], [0], [1], [0, 0, 1, 1], [], []>} : vector<8x128xf32>, vector<128x128xf32>, vector<8x128xf32> -> vector<8x128xf32>
    %cst_12 = arith.constant dense<0.000000e+00> : vector<8x128xf32>
    %45 = tpu.matmul %38, %3, %cst_12 {dimension_numbers = #tpu.dot_dimension_numbers<[1], [0], [0], [1], [0, 0, 1, 1], [], []>} : vector<8x32xf32>, vector<32x128xf32>, vector<8x128xf32> -> vector<8x128xf32>
    %46 = arith.addf %44, %45 : vector<8x128xf32>
    %47 = vector.extract_strided_slice %46 {offsets = [0, 0], sizes = [8, 32], strides = [1, 1]} : vector<8x128xf32> to vector<8x32xf32>
    %48 = arith.negf %47 : vector<8x32xf32>
    %49 = math.exp %48 : vector<8x32xf32>
    %cst_13 = arith.constant 1.000000e+00 : f32
    %50 = vector.broadcast %cst_13 : f32 to vector<8x32xf32>
    %51 = arith.addf %50, %49 : vector<8x32xf32>
    %52 = arith.divf %50, %51 : vector<8x32xf32>
    %53 = vector.extract_strided_slice %46 {offsets = [0, 32], sizes = [8, 32], strides = [1, 1]} : vector<8x128xf32> to vector<8x32xf32>
    %54 = arith.negf %53 : vector<8x32xf32>
    %55 = math.exp %54 : vector<8x32xf32>
    %cst_14 = arith.constant 1.000000e+00 : f32
    %56 = vector.broadcast %cst_14 : f32 to vector<8x32xf32>
    %57 = arith.addf %56, %55 : vector<8x32xf32>
    %58 = arith.divf %56, %57 : vector<8x32xf32>
    %59 = vector.extract_strided_slice %46 {offsets = [0, 64], sizes = [8, 32], strides = [1, 1]} : vector<8x128xf32> to vector<8x32xf32>
    %60 = math.tanh %59 : vector<8x32xf32>
    %61 = vector.extract_strided_slice %46 {offsets = [0, 96], sizes = [8, 32], strides = [1, 1]} : vector<8x128xf32> to vector<8x32xf32>
    %62 = arith.negf %61 : vector<8x32xf32>
    %63 = math.exp %62 : vector<8x32xf32>
    %cst_15 = arith.constant 1.000000e+00 : f32
    %64 = vector.broadcast %cst_15 : f32 to vector<8x32xf32>
    %65 = arith.addf %64, %63 : vector<8x32xf32>
    %66 = arith.divf %64, %65 : vector<8x32xf32>
    %67 = arith.mulf %58, %36 : vector<8x32xf32>
    %68 = arith.mulf %52, %60 : vector<8x32xf32>
    %69 = arith.addf %67, %68 : vector<8x32xf32>
    %70 = math.tanh %69 : vector<8x32xf32>
    %71 = arith.mulf %66, %70 : vector<8x32xf32>
    %72 = vector.extract_strided_slice %0 {offsets = [0, 2], sizes = [8, 1], strides = [1, 1]} : vector<8x8xi32> to vector<8x1xi32>
    %73 = vector.broadcast %72 : vector<8x1xi32> to vector<8x128xi32>
    %74 = arith.cmpi eq, %73, %1 : vector<8x128xi32>
    %75 = arith.extui %74 : vector<8x128xi1> to vector<8x128xi32>
    %76 = arith.sitofp %75 : vector<8x128xi32> to vector<8x128xf32>
    %cst_16 = arith.constant dense<0.000000e+00> : vector<8x128xf32>
    %77 = tpu.matmul %76, %2, %cst_16 {dimension_numbers = #tpu.dot_dimension_numbers<[1], [0], [0], [1], [0, 0, 1, 1], [], []>} : vector<8x128xf32>, vector<128x128xf32>, vector<8x128xf32> -> vector<8x128xf32>
    %cst_17 = arith.constant dense<0.000000e+00> : vector<8x128xf32>
    %78 = tpu.matmul %71, %3, %cst_17 {dimension_numbers = #tpu.dot_dimension_numbers<[1], [0], [0], [1], [0, 0, 1, 1], [], []>} : vector<8x32xf32>, vector<32x128xf32>, vector<8x128xf32> -> vector<8x128xf32>
    %79 = arith.addf %77, %78 : vector<8x128xf32>
    %80 = vector.extract_strided_slice %79 {offsets = [0, 0], sizes = [8, 32], strides = [1, 1]} : vector<8x128xf32> to vector<8x32xf32>
    %81 = arith.negf %80 : vector<8x32xf32>
    %82 = math.exp %81 : vector<8x32xf32>
    %cst_18 = arith.constant 1.000000e+00 : f32
    %83 = vector.broadcast %cst_18 : f32 to vector<8x32xf32>
    %84 = arith.addf %83, %82 : vector<8x32xf32>
    %85 = arith.divf %83, %84 : vector<8x32xf32>
    %86 = vector.extract_strided_slice %79 {offsets = [0, 32], sizes = [8, 32], strides = [1, 1]} : vector<8x128xf32> to vector<8x32xf32>
    %87 = arith.negf %86 : vector<8x32xf32>
    %88 = math.exp %87 : vector<8x32xf32>
    %cst_19 = arith.constant 1.000000e+00 : f32
    %89 = vector.broadcast %cst_19 : f32 to vector<8x32xf32>
    %90 = arith.addf %89, %88 : vector<8x32xf32>
    %91 = arith.divf %89, %90 : vector<8x32xf32>
    %92 = vector.extract_strided_slice %79 {offsets = [0, 64], sizes = [8, 32], strides = [1, 1]} : vector<8x128xf32> to vector<8x32xf32>
    %93 = math.tanh %92 : vector<8x32xf32>
    %94 = vector.extract_strided_slice %79 {offsets = [0, 96], sizes = [8, 32], strides = [1, 1]} : vector<8x128xf32> to vector<8x32xf32>
    %95 = arith.negf %94 : vector<8x32xf32>
    %96 = math.exp %95 : vector<8x32xf32>
    %cst_20 = arith.constant 1.000000e+00 : f32
    %97 = vector.broadcast %cst_20 : f32 to vector<8x32xf32>
    %98 = arith.addf %97, %96 : vector<8x32xf32>
    %99 = arith.divf %97, %98 : vector<8x32xf32>
    %100 = arith.mulf %91, %69 : vector<8x32xf32>
    %101 = arith.mulf %85, %93 : vector<8x32xf32>
    %102 = arith.addf %100, %101 : vector<8x32xf32>
    %103 = math.tanh %102 : vector<8x32xf32>
    %104 = arith.mulf %99, %103 : vector<8x32xf32>
    %105 = vector.extract_strided_slice %0 {offsets = [0, 3], sizes = [8, 1], strides = [1, 1]} : vector<8x8xi32> to vector<8x1xi32>
    %106 = vector.broadcast %105 : vector<8x1xi32> to vector<8x128xi32>
    %107 = arith.cmpi eq, %106, %1 : vector<8x128xi32>
    %108 = arith.extui %107 : vector<8x128xi1> to vector<8x128xi32>
    %109 = arith.sitofp %108 : vector<8x128xi32> to vector<8x128xf32>
    %cst_21 = arith.constant dense<0.000000e+00> : vector<8x128xf32>
    %110 = tpu.matmul %109, %2, %cst_21 {dimension_numbers = #tpu.dot_dimension_numbers<[1], [0], [0], [1], [0, 0, 1, 1], [], []>} : vector<8x128xf32>, vector<128x128xf32>, vector<8x128xf32> -> vector<8x128xf32>
    %cst_22 = arith.constant dense<0.000000e+00> : vector<8x128xf32>
    %111 = tpu.matmul %104, %3, %cst_22 {dimension_numbers = #tpu.dot_dimension_numbers<[1], [0], [0], [1], [0, 0, 1, 1], [], []>} : vector<8x32xf32>, vector<32x128xf32>, vector<8x128xf32> -> vector<8x128xf32>
    %112 = arith.addf %110, %111 : vector<8x128xf32>
    %113 = vector.extract_strided_slice %112 {offsets = [0, 0], sizes = [8, 32], strides = [1, 1]} : vector<8x128xf32> to vector<8x32xf32>
    %114 = arith.negf %113 : vector<8x32xf32>
    %115 = math.exp %114 : vector<8x32xf32>
    %cst_23 = arith.constant 1.000000e+00 : f32
    %116 = vector.broadcast %cst_23 : f32 to vector<8x32xf32>
    %117 = arith.addf %116, %115 : vector<8x32xf32>
    %118 = arith.divf %116, %117 : vector<8x32xf32>
    %119 = vector.extract_strided_slice %112 {offsets = [0, 32], sizes = [8, 32], strides = [1, 1]} : vector<8x128xf32> to vector<8x32xf32>
    %120 = arith.negf %119 : vector<8x32xf32>
    %121 = math.exp %120 : vector<8x32xf32>
    %cst_24 = arith.constant 1.000000e+00 : f32
    %122 = vector.broadcast %cst_24 : f32 to vector<8x32xf32>
    %123 = arith.addf %122, %121 : vector<8x32xf32>
    %124 = arith.divf %122, %123 : vector<8x32xf32>
    %125 = vector.extract_strided_slice %112 {offsets = [0, 64], sizes = [8, 32], strides = [1, 1]} : vector<8x128xf32> to vector<8x32xf32>
    %126 = math.tanh %125 : vector<8x32xf32>
    %127 = vector.extract_strided_slice %112 {offsets = [0, 96], sizes = [8, 32], strides = [1, 1]} : vector<8x128xf32> to vector<8x32xf32>
    %128 = arith.negf %127 : vector<8x32xf32>
    %129 = math.exp %128 : vector<8x32xf32>
    %cst_25 = arith.constant 1.000000e+00 : f32
    %130 = vector.broadcast %cst_25 : f32 to vector<8x32xf32>
    %131 = arith.addf %130, %129 : vector<8x32xf32>
    %132 = arith.divf %130, %131 : vector<8x32xf32>
    %133 = arith.mulf %124, %102 : vector<8x32xf32>
    %134 = arith.mulf %118, %126 : vector<8x32xf32>
    %135 = arith.addf %133, %134 : vector<8x32xf32>
    %136 = math.tanh %135 : vector<8x32xf32>
    %137 = arith.mulf %132, %136 : vector<8x32xf32>
    %138 = vector.extract_strided_slice %0 {offsets = [0, 4], sizes = [8, 1], strides = [1, 1]} : vector<8x8xi32> to vector<8x1xi32>
    %139 = vector.broadcast %138 : vector<8x1xi32> to vector<8x128xi32>
    %140 = arith.cmpi eq, %139, %1 : vector<8x128xi32>
    %141 = arith.extui %140 : vector<8x128xi1> to vector<8x128xi32>
    %142 = arith.sitofp %141 : vector<8x128xi32> to vector<8x128xf32>
    %cst_26 = arith.constant dense<0.000000e+00> : vector<8x128xf32>
    %143 = tpu.matmul %142, %2, %cst_26 {dimension_numbers = #tpu.dot_dimension_numbers<[1], [0], [0], [1], [0, 0, 1, 1], [], []>} : vector<8x128xf32>, vector<128x128xf32>, vector<8x128xf32> -> vector<8x128xf32>
    %cst_27 = arith.constant dense<0.000000e+00> : vector<8x128xf32>
    %144 = tpu.matmul %137, %3, %cst_27 {dimension_numbers = #tpu.dot_dimension_numbers<[1], [0], [0], [1], [0, 0, 1, 1], [], []>} : vector<8x32xf32>, vector<32x128xf32>, vector<8x128xf32> -> vector<8x128xf32>
    %145 = arith.addf %143, %144 : vector<8x128xf32>
    %146 = vector.extract_strided_slice %145 {offsets = [0, 0], sizes = [8, 32], strides = [1, 1]} : vector<8x128xf32> to vector<8x32xf32>
    %147 = arith.negf %146 : vector<8x32xf32>
    %148 = math.exp %147 : vector<8x32xf32>
    %cst_28 = arith.constant 1.000000e+00 : f32
    %149 = vector.broadcast %cst_28 : f32 to vector<8x32xf32>
    %150 = arith.addf %149, %148 : vector<8x32xf32>
    %151 = arith.divf %149, %150 : vector<8x32xf32>
    %152 = vector.extract_strided_slice %145 {offsets = [0, 32], sizes = [8, 32], strides = [1, 1]} : vector<8x128xf32> to vector<8x32xf32>
    %153 = arith.negf %152 : vector<8x32xf32>
    %154 = math.exp %153 : vector<8x32xf32>
    %cst_29 = arith.constant 1.000000e+00 : f32
    %155 = vector.broadcast %cst_29 : f32 to vector<8x32xf32>
    %156 = arith.addf %155, %154 : vector<8x32xf32>
    %157 = arith.divf %155, %156 : vector<8x32xf32>
    %158 = vector.extract_strided_slice %145 {offsets = [0, 64], sizes = [8, 32], strides = [1, 1]} : vector<8x128xf32> to vector<8x32xf32>
    %159 = math.tanh %158 : vector<8x32xf32>
    %160 = vector.extract_strided_slice %145 {offsets = [0, 96], sizes = [8, 32], strides = [1, 1]} : vector<8x128xf32> to vector<8x32xf32>
    %161 = arith.negf %160 : vector<8x32xf32>
    %162 = math.exp %161 : vector<8x32xf32>
    %cst_30 = arith.constant 1.000000e+00 : f32
    %163 = vector.broadcast %cst_30 : f32 to vector<8x32xf32>
    %164 = arith.addf %163, %162 : vector<8x32xf32>
    %165 = arith.divf %163, %164 : vector<8x32xf32>
    %166 = arith.mulf %157, %135 : vector<8x32xf32>
    %167 = arith.mulf %151, %159 : vector<8x32xf32>
    %168 = arith.addf %166, %167 : vector<8x32xf32>
    %169 = math.tanh %168 : vector<8x32xf32>
    %170 = arith.mulf %165, %169 : vector<8x32xf32>
    %171 = vector.extract_strided_slice %0 {offsets = [0, 5], sizes = [8, 1], strides = [1, 1]} : vector<8x8xi32> to vector<8x1xi32>
    %172 = vector.broadcast %171 : vector<8x1xi32> to vector<8x128xi32>
    %173 = arith.cmpi eq, %172, %1 : vector<8x128xi32>
    %174 = arith.extui %173 : vector<8x128xi1> to vector<8x128xi32>
    %175 = arith.sitofp %174 : vector<8x128xi32> to vector<8x128xf32>
    %cst_31 = arith.constant dense<0.000000e+00> : vector<8x128xf32>
    %176 = tpu.matmul %175, %2, %cst_31 {dimension_numbers = #tpu.dot_dimension_numbers<[1], [0], [0], [1], [0, 0, 1, 1], [], []>} : vector<8x128xf32>, vector<128x128xf32>, vector<8x128xf32> -> vector<8x128xf32>
    %cst_32 = arith.constant dense<0.000000e+00> : vector<8x128xf32>
    %177 = tpu.matmul %170, %3, %cst_32 {dimension_numbers = #tpu.dot_dimension_numbers<[1], [0], [0], [1], [0, 0, 1, 1], [], []>} : vector<8x32xf32>, vector<32x128xf32>, vector<8x128xf32> -> vector<8x128xf32>
    %178 = arith.addf %176, %177 : vector<8x128xf32>
    %179 = vector.extract_strided_slice %178 {offsets = [0, 0], sizes = [8, 32], strides = [1, 1]} : vector<8x128xf32> to vector<8x32xf32>
    %180 = arith.negf %179 : vector<8x32xf32>
    %181 = math.exp %180 : vector<8x32xf32>
    %cst_33 = arith.constant 1.000000e+00 : f32
    %182 = vector.broadcast %cst_33 : f32 to vector<8x32xf32>
    %183 = arith.addf %182, %181 : vector<8x32xf32>
    %184 = arith.divf %182, %183 : vector<8x32xf32>
    %185 = vector.extract_strided_slice %178 {offsets = [0, 32], sizes = [8, 32], strides = [1, 1]} : vector<8x128xf32> to vector<8x32xf32>
    %186 = arith.negf %185 : vector<8x32xf32>
    %187 = math.exp %186 : vector<8x32xf32>
    %cst_34 = arith.constant 1.000000e+00 : f32
    %188 = vector.broadcast %cst_34 : f32 to vector<8x32xf32>
    %189 = arith.addf %188, %187 : vector<8x32xf32>
    %190 = arith.divf %188, %189 : vector<8x32xf32>
    %191 = vector.extract_strided_slice %178 {offsets = [0, 64], sizes = [8, 32], strides = [1, 1]} : vector<8x128xf32> to vector<8x32xf32>
    %192 = math.tanh %191 : vector<8x32xf32>
    %193 = vector.extract_strided_slice %178 {offsets = [0, 96], sizes = [8, 32], strides = [1, 1]} : vector<8x128xf32> to vector<8x32xf32>
    %194 = arith.negf %193 : vector<8x32xf32>
    %195 = math.exp %194 : vector<8x32xf32>
    %cst_35 = arith.constant 1.000000e+00 : f32
    %196 = vector.broadcast %cst_35 : f32 to vector<8x32xf32>
    %197 = arith.addf %196, %195 : vector<8x32xf32>
    %198 = arith.divf %196, %197 : vector<8x32xf32>
    %199 = arith.mulf %190, %168 : vector<8x32xf32>
    %200 = arith.mulf %184, %192 : vector<8x32xf32>
    %201 = arith.addf %199, %200 : vector<8x32xf32>
    %202 = math.tanh %201 : vector<8x32xf32>
    %203 = arith.mulf %198, %202 : vector<8x32xf32>
    %204 = vector.extract_strided_slice %0 {offsets = [0, 6], sizes = [8, 1], strides = [1, 1]} : vector<8x8xi32> to vector<8x1xi32>
    %205 = vector.broadcast %204 : vector<8x1xi32> to vector<8x128xi32>
    %206 = arith.cmpi eq, %205, %1 : vector<8x128xi32>
    %207 = arith.extui %206 : vector<8x128xi1> to vector<8x128xi32>
    %208 = arith.sitofp %207 : vector<8x128xi32> to vector<8x128xf32>
    %cst_36 = arith.constant dense<0.000000e+00> : vector<8x128xf32>
    %209 = tpu.matmul %208, %2, %cst_36 {dimension_numbers = #tpu.dot_dimension_numbers<[1], [0], [0], [1], [0, 0, 1, 1], [], []>} : vector<8x128xf32>, vector<128x128xf32>, vector<8x128xf32> -> vector<8x128xf32>
    %cst_37 = arith.constant dense<0.000000e+00> : vector<8x128xf32>
    %210 = tpu.matmul %203, %3, %cst_37 {dimension_numbers = #tpu.dot_dimension_numbers<[1], [0], [0], [1], [0, 0, 1, 1], [], []>} : vector<8x32xf32>, vector<32x128xf32>, vector<8x128xf32> -> vector<8x128xf32>
    %211 = arith.addf %209, %210 : vector<8x128xf32>
    %212 = vector.extract_strided_slice %211 {offsets = [0, 0], sizes = [8, 32], strides = [1, 1]} : vector<8x128xf32> to vector<8x32xf32>
    %213 = arith.negf %212 : vector<8x32xf32>
    %214 = math.exp %213 : vector<8x32xf32>
    %cst_38 = arith.constant 1.000000e+00 : f32
    %215 = vector.broadcast %cst_38 : f32 to vector<8x32xf32>
    %216 = arith.addf %215, %214 : vector<8x32xf32>
    %217 = arith.divf %215, %216 : vector<8x32xf32>
    %218 = vector.extract_strided_slice %211 {offsets = [0, 32], sizes = [8, 32], strides = [1, 1]} : vector<8x128xf32> to vector<8x32xf32>
    %219 = arith.negf %218 : vector<8x32xf32>
    %220 = math.exp %219 : vector<8x32xf32>
    %cst_39 = arith.constant 1.000000e+00 : f32
    %221 = vector.broadcast %cst_39 : f32 to vector<8x32xf32>
    %222 = arith.addf %221, %220 : vector<8x32xf32>
    %223 = arith.divf %221, %222 : vector<8x32xf32>
    %224 = vector.extract_strided_slice %211 {offsets = [0, 64], sizes = [8, 32], strides = [1, 1]} : vector<8x128xf32> to vector<8x32xf32>
    %225 = math.tanh %224 : vector<8x32xf32>
    %226 = vector.extract_strided_slice %211 {offsets = [0, 96], sizes = [8, 32], strides = [1, 1]} : vector<8x128xf32> to vector<8x32xf32>
    %227 = arith.negf %226 : vector<8x32xf32>
    %228 = math.exp %227 : vector<8x32xf32>
    %cst_40 = arith.constant 1.000000e+00 : f32
    %229 = vector.broadcast %cst_40 : f32 to vector<8x32xf32>
    %230 = arith.addf %229, %228 : vector<8x32xf32>
    %231 = arith.divf %229, %230 : vector<8x32xf32>
    %232 = arith.mulf %223, %201 : vector<8x32xf32>
    %233 = arith.mulf %217, %225 : vector<8x32xf32>
    %234 = arith.addf %232, %233 : vector<8x32xf32>
    %235 = math.tanh %234 : vector<8x32xf32>
    %236 = arith.mulf %231, %235 : vector<8x32xf32>
    %237 = vector.extract_strided_slice %0 {offsets = [0, 7], sizes = [8, 1], strides = [1, 1]} : vector<8x8xi32> to vector<8x1xi32>
    %238 = vector.broadcast %237 : vector<8x1xi32> to vector<8x128xi32>
    %239 = arith.cmpi eq, %238, %1 : vector<8x128xi32>
    %240 = arith.extui %239 : vector<8x128xi1> to vector<8x128xi32>
    %241 = arith.sitofp %240 : vector<8x128xi32> to vector<8x128xf32>
    %cst_41 = arith.constant dense<0.000000e+00> : vector<8x128xf32>
    %242 = tpu.matmul %241, %2, %cst_41 {dimension_numbers = #tpu.dot_dimension_numbers<[1], [0], [0], [1], [0, 0, 1, 1], [], []>} : vector<8x128xf32>, vector<128x128xf32>, vector<8x128xf32> -> vector<8x128xf32>
    %cst_42 = arith.constant dense<0.000000e+00> : vector<8x128xf32>
    %243 = tpu.matmul %236, %3, %cst_42 {dimension_numbers = #tpu.dot_dimension_numbers<[1], [0], [0], [1], [0, 0, 1, 1], [], []>} : vector<8x32xf32>, vector<32x128xf32>, vector<8x128xf32> -> vector<8x128xf32>
    %244 = arith.addf %242, %243 : vector<8x128xf32>
    %245 = vector.extract_strided_slice %244 {offsets = [0, 0], sizes = [8, 32], strides = [1, 1]} : vector<8x128xf32> to vector<8x32xf32>
    %246 = arith.negf %245 : vector<8x32xf32>
    %247 = math.exp %246 : vector<8x32xf32>
    %cst_43 = arith.constant 1.000000e+00 : f32
    %248 = vector.broadcast %cst_43 : f32 to vector<8x32xf32>
    %249 = arith.addf %248, %247 : vector<8x32xf32>
    %250 = arith.divf %248, %249 : vector<8x32xf32>
    %251 = vector.extract_strided_slice %244 {offsets = [0, 32], sizes = [8, 32], strides = [1, 1]} : vector<8x128xf32> to vector<8x32xf32>
    %252 = arith.negf %251 : vector<8x32xf32>
    %253 = math.exp %252 : vector<8x32xf32>
    %cst_44 = arith.constant 1.000000e+00 : f32
    %254 = vector.broadcast %cst_44 : f32 to vector<8x32xf32>
    %255 = arith.addf %254, %253 : vector<8x32xf32>
    %256 = arith.divf %254, %255 : vector<8x32xf32>
    %257 = vector.extract_strided_slice %244 {offsets = [0, 64], sizes = [8, 32], strides = [1, 1]} : vector<8x128xf32> to vector<8x32xf32>
    %258 = math.tanh %257 : vector<8x32xf32>
    %259 = vector.extract_strided_slice %244 {offsets = [0, 96], sizes = [8, 32], strides = [1, 1]} : vector<8x128xf32> to vector<8x32xf32>
    %260 = arith.negf %259 : vector<8x32xf32>
    %261 = math.exp %260 : vector<8x32xf32>
    %cst_45 = arith.constant 1.000000e+00 : f32
    %262 = vector.broadcast %cst_45 : f32 to vector<8x32xf32>
    %263 = arith.addf %262, %261 : vector<8x32xf32>
    %264 = arith.divf %262, %263 : vector<8x32xf32>
    %265 = arith.mulf %256, %234 : vector<8x32xf32>
    %266 = arith.mulf %250, %258 : vector<8x32xf32>
    %267 = arith.addf %265, %266 : vector<8x32xf32>
    %268 = math.tanh %267 : vector<8x32xf32>
    %269 = arith.mulf %264, %268 : vector<8x32xf32>
    %270 = vector.extract_strided_slice %0 {offsets = [0, 7], sizes = [8, 1], strides = [1, 1]} : vector<8x8xi32> to vector<8x1xi32>
    %271 = vector.broadcast %270 : vector<8x1xi32> to vector<8x128xi32>
    %272 = arith.cmpi eq, %271, %1 : vector<8x128xi32>
    %273 = arith.extui %272 : vector<8x128xi1> to vector<8x128xi32>
    %274 = arith.sitofp %273 : vector<8x128xi32> to vector<8x128xf32>
    %c0_46 = arith.constant 0 : index
    %c0_47 = arith.constant 0 : index
    %275 = vector.load %arg3[%c0_46, %c0_47] : memref<128x128xf32, #tpu.memory_space<vmem>>, vector<128x128xf32>
    %cst_48 = arith.constant dense<0.000000e+00> : vector<8x128xf32>
    %276 = tpu.matmul %274, %275, %cst_48 {dimension_numbers = #tpu.dot_dimension_numbers<[1], [0], [0], [1], [0, 0, 1, 1], [], []>} : vector<8x128xf32>, vector<128x128xf32>, vector<8x128xf32> -> vector<8x128xf32>
    %277 = vector.extract_strided_slice %276 {offsets = [0, 0], sizes = [8, 32], strides = [1, 1]} : vector<8x128xf32> to vector<8x32xf32>
    %278 = arith.negf %277 : vector<8x32xf32>
    %279 = math.exp %278 : vector<8x32xf32>
    %cst_49 = arith.constant 1.000000e+00 : f32
    %280 = vector.broadcast %cst_49 : f32 to vector<8x32xf32>
    %281 = arith.addf %280, %279 : vector<8x32xf32>
    %282 = arith.divf %280, %281 : vector<8x32xf32>
    %283 = vector.extract_strided_slice %276 {offsets = [0, 64], sizes = [8, 32], strides = [1, 1]} : vector<8x128xf32> to vector<8x32xf32>
    %284 = math.tanh %283 : vector<8x32xf32>
    %285 = vector.extract_strided_slice %276 {offsets = [0, 96], sizes = [8, 32], strides = [1, 1]} : vector<8x128xf32> to vector<8x32xf32>
    %286 = arith.negf %285 : vector<8x32xf32>
    %287 = math.exp %286 : vector<8x32xf32>
    %cst_50 = arith.constant 1.000000e+00 : f32
    %288 = vector.broadcast %cst_50 : f32 to vector<8x32xf32>
    %289 = arith.addf %288, %287 : vector<8x32xf32>
    %290 = arith.divf %288, %289 : vector<8x32xf32>
    %291 = arith.mulf %282, %284 : vector<8x32xf32>
    %292 = math.tanh %291 : vector<8x32xf32>
    %293 = arith.mulf %290, %292 : vector<8x32xf32>
    %c0_51 = arith.constant 0 : index
    %c0_52 = arith.constant 0 : index
    %294 = vector.load %arg5[%c0_51, %c0_52] : memref<32x2xf32, #tpu.memory_space<vmem>>, vector<32x2xf32>
    %cst_53 = arith.constant dense<0.000000e+00> : vector<8x2xf32>
    %295 = tpu.matmul %269, %294, %cst_53 {dimension_numbers = #tpu.dot_dimension_numbers<[1], [0], [0], [1], [0, 0, 1, 1], [], []>} : vector<8x32xf32>, vector<32x2xf32>, vector<8x2xf32> -> vector<8x2xf32>
    %c0_54 = arith.constant 0 : index
    %c0_55 = arith.constant 0 : index
    %296 = vector.load %arg6[%c0_54, %c0_55] : memref<32x2xf32, #tpu.memory_space<vmem>>, vector<32x2xf32>
    %cst_56 = arith.constant dense<0.000000e+00> : vector<8x2xf32>
    %297 = tpu.matmul %293, %296, %cst_56 {dimension_numbers = #tpu.dot_dimension_numbers<[1], [0], [0], [1], [0, 0, 1, 1], [], []>} : vector<8x32xf32>, vector<32x2xf32>, vector<8x2xf32> -> vector<8x2xf32>
    %298 = arith.addf %295, %297 : vector<8x2xf32>
    %c0_57 = arith.constant 0 : index
    %c0_58 = arith.constant 0 : index
    %299 = vector.load %arg7[%c0_57, %c0_58] : memref<1x2xf32, #tpu.memory_space<vmem>>, vector<1x2xf32>
    %300 = vector.broadcast %299 : vector<1x2xf32> to vector<8x2xf32>
    %301 = arith.addf %298, %300 : vector<8x2xf32>
    %c0_59 = arith.constant 0 : index
    %c0_60 = arith.constant 0 : index
    %302 = vector.load %arg8[%c0_59, %c0_60] : memref<8x2xf32, #tpu.memory_space<vmem>>, vector<8x2xf32>
    tpu.vector_store %arg8[%c0_59, %c0_60], %301 {strides = array<i32>} : memref<8x2xf32, #tpu.memory_space<vmem>>, vector<8x2xf32>,
    return
  }
  func.func @transform_0(%arg0: i32) -> (i32, i32) {
    %c0_i32 = arith.constant 0 : i32
    %c0_i32_0 = arith.constant 0 : i32
    return %arg0, %c0_i32 : i32, i32
  }
  func.func @transform_1(%arg0: i32) -> (i32, i32) {
    %c0_i32 = arith.constant 0 : i32
    %c0_i32_0 = arith.constant 0 : i32
    %c0_i32_1 = arith.constant 0 : i32
    return %c0_i32, %c0_i32_0 : i32, i32
  }
  func.func @transform_2(%arg0: i32) -> (i32, i32) {
    %c0_i32 = arith.constant 0 : i32
    %c0_i32_0 = arith.constant 0 : i32
    %c0_i32_1 = arith.constant 0 : i32
    return %c0_i32, %c0_i32_0 : i32, i32
  }
  func.func @transform_3(%arg0: i32) -> (i32, i32) {
    %c0_i32 = arith.constant 0 : i32
    %c0_i32_0 = arith.constant 0 : i32
    %c0_i32_1 = arith.constant 0 : i32
    return %c0_i32, %c0_i32_0 : i32, i32
  }
  func.func @transform_4(%arg0: i32) -> (i32, i32) {
    %c0_i32 = arith.constant 0 : i32
    %c0_i32_0 = arith.constant 0 : i32
    %c0_i32_1 = arith.constant 0 : i32
    return %c0_i32, %c0_i32_0 : i32, i32
  }
  func.func @transform_5(%arg0: i32) -> (i32, i32) {
    %c0_i32 = arith.constant 0 : i32
    %c0_i32_0 = arith.constant 0 : i32
    %c0_i32_1 = arith.constant 0 : i32
    return %c0_i32, %c0_i32_0 : i32, i32
  }
  func.func @transform_6(%arg0: i32) -> (i32, i32) {
    %c0_i32 = arith.constant 0 : i32
    %c0_i32_0 = arith.constant 0 : i32
    %c0_i32_1 = arith.constant 0 : i32
    return %c0_i32, %c0_i32_0 : i32, i32
  }
  func.func @transform_7(%arg0: i32) -> (i32, i32) {
    %c0_i32 = arith.constant 0 : i32
    %c0_i32_0 = arith.constant 0 : i32
    return %arg0, %c0_i32 : i32, i32
  }
}

</mosaic_0001>

<bundles_post_ra>
// kernel: model_forward.1
= control target key start
LH: loop header
LB: loop body
LE: loop exit
PB: predicated region body
PF: predicated region fallthrough
CT: control target
= control target key end

     0   :  { %12 = vsyncpa [#allocation3], 0  ;;  %s3199_s0 = inlined_call_operand.vmem [shape: s32[8,8], index: 0, kind: input, shape index: {}]   ;;  %s3200_s1 = inlined_call_operand.hbm [shape: f32[128,128], index: 1, kind: input, shape index: {}]   ;;  %s3201_s2 = inlined_call_operand.hbm [shape: f32[128,128], index: 2, kind: input, shape index: {}]   ;;  %s3202_s3 = inlined_call_operand.vmem [shape: f32[32,128], index: 3, kind: input, shape index: {}]   ;;  %s3203_s4 = inlined_call_operand.vmem [shape: f32[32,2], index: 4, kind: input, shape index: {}]   ;;  %s3204_s5 = inlined_call_operand.vmem [shape: f32[32,2], index: 5, kind: input, shape index: {}]   ;;  %s3205_s6 = inlined_call_operand.vmem [shape: f32[1,2], index: 6, kind: input, shape index: {}]   ;;  %s3206_s7 = inlined_call_operand.vmem [shape: f32[8,2], index: 7, kind: output, shape index: {}]  }
   0x1   :  { %13 = vsyncpa [#allocation5], 0  ;;  %s2577_s24 = smov [#allocation2]  }
   0x2   :  { %s21_s25 = sshll.u32 %s2577_s24, 4  ;;  %s22_s25 = int_to_ptr.vmem [resolvable:$true] %s21_s25 }
   0x3   :  { %s2541_s26 = scalar_lea.vmem %s22_s25, 2048  ;;  %p2546_p1 = scmp.lt.s32.totalorder %s22_s25, %s22_s25 }
   0x4   :  { %p2542_p0 = scmp.ne.s32.totalorder %s22_s25, %s2541_s26  ;;  %p2547_p2 = scmp.lt.s32.totalorder %s2541_s26, %s2541_s26 }
   0x6   :  { %p2548_p3 = por %p2547_p2, %p2546_p1 }
   0x8   :  { %p2549_p4 = pnand %p2548_p3, %p2542_p0 }
   0xa   :  { %2552 = shalt.err (!%p2549_p4)
}
   0xb   :  { %s2578_s27 = smov 128   ;;  %s2579_s28 = smov 8  }
   0xc   :  { %27 = dma.hbm_to_vmem [thread:$0]  %s3200_s1, 2048, %s22_s25, [#allocation3], %s2578_s27, %s2578_s27, %s2579_s28  }
   0xd   :  { %s2580_s8 = smov [#allocation4]  }
   0xe   :  { %s33_s9 = sshll.u32 %s2580_s8, 4  ;;  %s34_s9 = int_to_ptr.vmem [resolvable:$true] %s33_s9 }
   0xf   :  { %s2561_s10 = scalar_lea.vmem %s34_s9, 2048  ;;  %p2566_p6 = scmp.lt.s32.totalorder %s34_s9, %s34_s9 }
  0x10   :  { %p2562_p5 = scmp.ne.s32.totalorder %s34_s9, %s2561_s10  ;;  %p2567_p7 = scmp.lt.s32.totalorder %s2561_s10, %s2561_s10 }
  0x12   :  { %p2568_p8 = por %p2567_p7, %p2566_p6 }
  0x14   :  { %p2569_p9 = pnand %p2568_p8, %p2562_p5 }
  0x16   :  { %2572 = shalt.err (!%p2569_p9)
}
  0x17   :  { %39 = dma.hbm_to_vmem [thread:$0]  %s3201_s2, 2048, %s34_s9, [#allocation5], %s2578_s27, %s2578_s27, %s2579_s28  }
  0x18   :  { %2573 = dma.done.wait [#allocation3], 2048  }
  0x19   :  { %2574 = vsyncadd [#allocation3], 4294965248 }
  0x1a   :  { %2575 = dma.done.wait [#allocation5], 2048  }
  0x1b   :  { %2576 = vsyncadd [#allocation5], 4294965248  ;;  %v2581_v0 = vmov 0   ;;  %v2582_v1 = vmov 0.0   ;;  %vm2583_vm0 = vmmov 0   ;;  %v2650_v2 = vld [vmem:[%s3199_s0] sm:$0xff]  ;;  %v55_v23 = vlaneseq }
  0x1c   :  { %2436 = vset.pattern.permute.xlu0 %v2581_v0  ;;  %2004 = vmatprep.subr.mxu1 %v2582_v1  ;;  %v2652_v3 = vld [vmem:[#allocation2 + $0x78] sm:$0xff]  ;;  %v2654_v4 = vld [vmem:[#allocation2 + $0x70] sm:$0xff]  ;;  %v2659_v5 = vld [vmem:[#allocation2 + $0x68] sm:$0xff]  ;;  %v2584_v26 = vmov 1.0   ;;  %s2586_s21 = smov 32   ;;  %v2587_v42 = vmov 1  }
  0x1d   :  { %1993 = vmatprep.subr.mxu0 %v2582_v1  ;;  %2001 = vmatprep.mubr.msk.f32.mxu0 %vm2583_vm0, %v2582_v1  ;;  %v2663_v6 = vld [vmem:[#allocation2 + $0x60] sm:$0xff]  ;;  %v2668_v7 = vld [vmem:[%s3202_s3 + $0x18] sm:$0xff]  ;;  %v2673_v8 = vld [vmem:[%s3202_s3 + $0x10] sm:$0xff]  ;;  %v2756_v24 = vand.u32 127, %v55_v23  ;;  %vm83_vm2 = vcmask 261120   ;;  %v2588_v63 = vmov 2  }
  0x1e   :  { %2036 = vmatprep.mubr.msk.f32.mxu1 %vm2583_vm0, %v2582_v1  ;;  %78 = vperm.xlu0 %2436, %v2650_v2   ;;  %v2678_v9 = vld [vmem:[#allocation2 + $0x58] sm:$0xff]  ;;  %v2684_v10 = vld [vmem:[%s3202_s3 + $0x8] sm:$0xff]  ;;  %v2689_v11 = vld [vmem:[#allocation2 + $0x50] sm:$0xff]  ;;  %s2594_s27 = smov 96   ;;  %vm1746_vm10 = vcmask 15360  }
  0x1f   :  { %2005 = vmatpush3.msra.mxu1 %v2652_v3  ;;  %1994 = vmatpush3.msra.mxu0 %v2668_v7  ;;  %v2695_v12 = vld [vmem:[%s3202_s3] sm:$0xff]  ;;  %v2700_v13 = vld [vmem:[#allocation2 + $0x48] sm:$0xff]  ;;  %v2712_v15 = vld [vmem:[#allocation2 + $0x38] sm:$0xff]  ;;  %s2585_s3 = smov 64  }
  0x20   :  { %2006 = vmatprep.subr.mxu1 %v2582_v1  ;;  %1995 = vmatprep.subr.mxu0 %v2582_v1  ;;  %v2706_v14 = vld [vmem:[#allocation2 + $0x40] sm:$0xff]  ;;  %v2718_v16 = vld [vmem:[#allocation2 + $0x30] sm:$0xff]  ;;  %v2724_v17 = vld [vmem:[#allocation2 + $0x28] sm:$0xff] }
  0x21   :  { %2007 = vmatpush3.msra.mxu1 %v2654_v4  ;;  %1996 = vmatpush3.msra.mxu0 %v2673_v8  ;;  %v2730_v18 = vld [vmem:[#allocation2 + $0x20] sm:$0xff]  ;;  %v2737_v19 = vld [vmem:[#allocation2 + $0x18] sm:$0xff]  ;;  %v2742_v20 = vld [vmem:[#allocation2 + $0x10] sm:$0xff] }
  0x22   :  { %2008 = vmatprep.subr.mxu1 %v2582_v1  ;;  %1997 = vmatprep.subr.mxu0 %v2582_v1  ;;  %v2746_v21 = vld [vmem:[#allocation2 + $0x8] sm:$0xff]  ;;  %v2750_v22 = vld [vmem:[#allocation2] sm:$0xff] }
  0x23   :  { %2009 = vmatpush3.msra.mxu1 %v2659_v5  ;;  %1998 = vmatpush3.msra.mxu0 %v2684_v10 }
  0x24   :  { %2010 = vmatprep.subr.mxu1 %v2582_v1  ;;  %1999 = vmatprep.subr.mxu0 %v2582_v1 }
  0x25   :  { %2011 = vmatpush3.msra.mxu1 %v2663_v6  ;;  %2000 = vmatpush3.msra.mxu0 %v2695_v12 }
  0x26   :  { %2012 = vmatprep.subr.mxu1 %v2582_v1  ;;  %2002 = vmatmul.mubr.f32.vlgmr.msra.gmra.mxu0 %v2582_v1 }
  0x27   :  { %2013 = vmatpush3.msra.mxu1 %v2678_v9  ;;  %2039 = vmatprep.subr.mxu0 %v2582_v1 }
  0x28   :  { %2014 = vmatprep.subr.mxu1 %v2582_v1  ;;  %2040 = vmatpush3.msra.mxu0 %v2668_v7 }
  0x29   :  { %2015 = vmatpush3.msra.mxu1 %v2689_v11  ;;  %2041 = vmatprep.subr.mxu0 %v2582_v1 }
  0x2a   :  { %2016 = vmatprep.subr.mxu1 %v2582_v1  ;;  %2042 = vmatpush3.msra.mxu0 %v2673_v8 }
  0x2b   :  { %2017 = vmatpush3.msra.mxu1 %v2700_v13  ;;  %2043 = vmatprep.subr.mxu0 %v2582_v1 }
  0x2c   :  { %2018 = vmatprep.subr.mxu1 %v2582_v1  ;;  %2044 = vmatpush3.msra.mxu0 %v2684_v10 }
  0x2d   :  { %2019 = vmatpush3.msra.mxu1 %v2706_v14  ;;  %2045 = vmatprep.subr.mxu0 %v2582_v1 }
  0x2e   :  { %2020 = vmatprep.subr.mxu1 %v2582_v1  ;;  %2046 = vmatpush3.msra.mxu0 %v2695_v12 }
  0x2f   :  { %2021 = vmatpush3.msra.mxu1 %v2712_v15  ;;  %2047 = vmatprep.mubr.msk.f32.mxu0 %vm2583_vm0, %v2582_v1 }
  0x30   :  { %2022 = vmatprep.subr.mxu1 %v2582_v1  ;;  %2050 = vmatprep.subr.mxu0 %v2582_v1 }
  0x31   :  { %2023 = vmatpush3.msra.mxu1 %v2718_v16  ;;  %2437 = vset.pattern.permute.xlu1 %v2587_v42 }
  0x32   :  { %2024 = vmatprep.subr.mxu1 %v2582_v1  ;;  %2438 = vset.pattern.permute.xlu0 %v2588_v63 }
  0x33   :  { %2025 = vmatpush3.msra.mxu1 %v2724_v17 }
  0x34   :  { %2026 = vmatprep.subr.mxu1 %v2582_v1 }
  0x35   :  { %2027 = vmatpush3.msra.mxu1 %v2730_v18 }
  0x36   :  { %2028 = vmatprep.subr.mxu1 %v2582_v1 }
  0x37   :  { %2029 = vmatpush3.msra.mxu1 %v2737_v19 }
  0x38   :  { %2030 = vmatprep.subr.mxu1 %v2582_v1 }
  0x39   :  { %2031 = vmatpush3.msra.mxu1 %v2742_v20 }
  0x3a   :  { %2032 = vmatprep.subr.mxu1 %v2582_v1 }
  0x3b   :  { %2033 = vmatpush3.msra.mxu1 %v2746_v21 }
  0x3c   :  { %2034 = vmatprep.subr.mxu1 %v2582_v1 }
  0x3d   :  { %2035 = vmatpush3.msra.mxu1 %v2750_v22 }
  0x3e   :  { %2085 = vmatprep.subr.mxu1 %v2582_v1 }
  0x99   :  { %v79_v25 = vpop.permute.xlu0 %78 }
  0x9a   :  { %vm80_vm1 = vcmp.eq.s32.totalorder %v79_v25, %v2756_v24 }
  0x9b   :  { %2037 = vmatmul.mubr.msk.f32.vlgmr.msra.gmra.mxu1 %vm80_vm1, %v2584_v26 }
  0x9c   :  { %2086 = vmatpush3.msra.mxu1 %v2668_v7  ;;  %2093 = vmatprep.mubr.msk.f32.mxu1 %vm2583_vm0, %v2582_v1 }
  0x9d   :  { %2087 = vmatprep.subr.mxu1 %v2582_v1 }
  0x9e   :  { %2088 = vmatpush3.msra.mxu1 %v2673_v8 }
  0x9f   :  { %2089 = vmatprep.subr.mxu1 %v2582_v1 }
  0xa0   :  { %2090 = vmatpush3.msra.mxu1 %v2684_v10 }
  0xa1   :  { %2091 = vmatprep.subr.mxu1 %v2582_v1 }
  0xa2   :  { %2092 = vmatpush3.msra.mxu1 %v2695_v12 }
  0xa3   :  { %2096 = vmatprep.subr.mxu1 %v2582_v1 }
  0xe6   :  { %v153_v27 = vpop.f32.mrf.mxu0 }
  0xe8   :  { %v2003_v28 = vpop.f32.mrf.mxu0 }
 0x15b   :  { %v223_v29 = vpop.f32.mrf.mxu1 }
 0x15c   :  { %v224_v30 = vadd.f32 %v223_v29, %v153_v27 }
 0x15d   :  { %v2038_v31 = vpop.f32.mrf.mxu1 }
 0x15e   :  { %2444 = vtanh.f32 %v224_v30  ;;  %v1756_v33 = vmul.f32 -1.442695, %v224_v30 }
 0x160   :  { %2446 = vpow2.f32 %v1756_v33 }
 0x16b   :  { %v2445_v32 = vpop.eup %2444 }
 0x16c   :  { %236 = vrot.lane.b32.xlu0 %v2445_v32, %s2585_s3 }
 0x16d   :  { %v2447_v34 = vpop.eup %2446 }
 0x16e   :  { %v230_v35 = vadd.f32 1.0, %v2447_v34 }
 0x170   :  { %2448 = vrcp.f32 %v230_v35 }
 0x17d   :  { %v2449_v36 = vpop.eup %2448 }
 0x17e   :  { %v234_v39 = vmul.f32 0.0, %v2449_v36 }
 0x1de   :  { %v237_v37 = vpop.permute.xlu0 %236 }
 0x1df   :  { %v239_v38 = vmul.f32 %v2449_v36, %v237_v37 }
 0x1e1   :  { %241 = vrot.lane.b32.xlu1 %v239_v38, %s2586_s21 }
 0x253   :  { %v242_v40 = vpop.permute.xlu1 %241 }
 0x254   :  { %v2772_v41 = vadd.f32 %v242_v40, %v234_v39 }
 0x256   :  { %2450 = vtanh.f32 %v2772_v41 }
 0x263   :  { %v2451_v43 = vpop.eup %2450 }
 0x264   :  { %247 = vrot.lane.b32.xlu1 %v2451_v43, %s2585_s3 }
 0x268   :  { %252 = vperm.xlu1 %2437, %v2650_v2  }
 0x2d6   :  { %v248_v44 = vpop.permute.xlu1 %247 }
 0x2d7   :  { %v250_v45 = vmul.f32 %v2449_v36, %v248_v44  ;;  %v2589_v44 = vmov 3  }
 0x2d9   :  { %258 = vrot.lane.b32.xlu0 %v250_v45, %s2586_s21 }
 0x2e3   :  { %v253_v47 = vpop.permute.xlu1 %252 }
 0x2e4   :  { %vm254_vm3 = vcmp.eq.s32.totalorder %v253_v47, %v2756_v24 }
 0x34b   :  { %v259_v46 = vpop.permute.xlu0 %258 }
 0x34c   :  { %2048 = vmatmul.mubr.msk.f32.vlgmr.msra.gmra.mxu0 %vm83_vm2, %v259_v46 }
 0x34d   :  { %2051 = vmatpush3.msra.mxu0 %v2652_v3  ;;  %2082 = vmatprep.mubr.msk.f32.mxu0 %vm2583_vm0, %v2582_v1 }
 0x34e   :  { %2052 = vmatprep.subr.mxu0 %v2582_v1 }
 0x34f   :  { %2053 = vmatpush3.msra.mxu0 %v2654_v4 }
 0x350   :  { %2054 = vmatprep.subr.mxu0 %v2582_v1 }
 0x351   :  { %2055 = vmatpush3.msra.mxu0 %v2659_v5 }
 0x352   :  { %2056 = vmatprep.subr.mxu0 %v2582_v1 }
 0x353   :  { %2057 = vmatpush3.msra.mxu0 %v2663_v6 }
 0x354   :  { %2058 = vmatprep.subr.mxu0 %v2582_v1 }
 0x355   :  { %2059 = vmatpush3.msra.mxu0 %v2678_v9 }
 0x356   :  { %2060 = vmatprep.subr.mxu0 %v2582_v1 }
 0x357   :  { %2061 = vmatpush3.msra.mxu0 %v2689_v11 }
 0x358   :  { %2062 = vmatprep.subr.mxu0 %v2582_v1 }
 0x359   :  { %2063 = vmatpush3.msra.mxu0 %v2700_v13 }
 0x35a   :  { %2064 = vmatprep.subr.mxu0 %v2582_v1 }
 0x35b   :  { %2065 = vmatpush3.msra.mxu0 %v2706_v14 }
 0x35c   :  { %2066 = vmatprep.subr.mxu0 %v2582_v1 }
 0x35d   :  { %2067 = vmatpush3.msra.mxu0 %v2712_v15 }
 0x35e   :  { %2068 = vmatprep.subr.mxu0 %v2582_v1 }
 0x35f   :  { %2069 = vmatpush3.msra.mxu0 %v2718_v16 }
 0x360   :  { %2070 = vmatprep.subr.mxu0 %v2582_v1 }
 0x361   :  { %2071 = vmatpush3.msra.mxu0 %v2724_v17 }
 0x362   :  { %2072 = vmatprep.subr.mxu0 %v2582_v1 }
 0x363   :  { %2073 = vmatpush3.msra.mxu0 %v2730_v18 }
 0x364   :  { %2074 = vmatprep.subr.mxu0 %v2582_v1 }
 0x365   :  { %2075 = vmatpush3.msra.mxu0 %v2737_v19 }
 0x366   :  { %2076 = vmatprep.subr.mxu0 %v2582_v1 }
 0x367   :  { %2077 = vmatpush3.msra.mxu0 %v2742_v20 }
 0x368   :  { %2078 = vmatprep.subr.mxu0 %v2582_v1 }
 0x369   :  { %2079 = vmatpush3.msra.mxu0 %v2746_v21 }
 0x36a   :  { %2080 = vmatprep.subr.mxu0 %v2582_v1 }
 0x36b   :  { %2081 = vmatpush3.msra.mxu0 %v2750_v22 }
 0x36c   :  { %2083 = vmatmul.mubr.msk.f32.vlgmr.msra.gmra.mxu0 %vm254_vm3, %v2584_v26  ;;  %2131 = vmatprep.subr.mxu0 %v2582_v1 }
 0x36d   :  { %2132 = vmatpush3.msra.mxu0 %v2668_v7  ;;  %2139 = vmatprep.mubr.msk.f32.mxu0 %vm2583_vm0, %v2582_v1 }
 0x36e   :  { %2133 = vmatprep.subr.mxu0 %v2582_v1 }
 0x36f   :  { %2134 = vmatpush3.msra.mxu0 %v2673_v8 }
 0x370   :  { %2135 = vmatprep.subr.mxu0 %v2582_v1 }
 0x371   :  { %2136 = vmatpush3.msra.mxu0 %v2684_v10 }
 0x372   :  { %2137 = vmatprep.subr.mxu0 %v2582_v1 }
 0x373   :  { %2138 = vmatpush3.msra.mxu0 %v2695_v12 }
 0x374   :  { %2142 = vmatprep.subr.mxu0 %v2582_v1 }
 0x40c   :  { %v328_v48 = vpop.f32.mrf.mxu0 }
 0x40e   :  { %v2049_v49 = vpop.f32.mrf.mxu0 }
 0x42c   :  { %v398_v50 = vpop.f32.mrf.mxu0 }
 0x42d   :  { %v399_v51 = vadd.f32 %v398_v50, %v328_v48 }
 0x42e   :  { %v2084_v52 = vpop.f32.mrf.mxu0 }
 0x42f   :  { %2452 = vtanh.f32 %v399_v51  ;;  %v1760_v54 = vmul.f32 -1.442695, %v399_v51 }
 0x431   :  { %2454 = vpow2.f32 %v1760_v54 }
 0x43c   :  { %v2453_v53 = vpop.eup %2452 }
 0x43d   :  { %411 = vrot.lane.b32.xlu0 %v2453_v53, %s2585_s3 }
 0x43e   :  { %v2455_v55 = vpop.eup %2454 }
 0x43f   :  { %v405_v56 = vadd.f32 1.0, %v2455_v55 }
 0x441   :  { %2456 = vrcp.f32 %v405_v56 }
 0x44e   :  { %v2457_v57 = vpop.eup %2456 }
 0x44f   :  { %v409_v60 = vmul.f32 %v2457_v57, %v2772_v41 }
 0x4af   :  { %v412_v58 = vpop.permute.xlu0 %411 }
 0x4b0   :  { %v414_v59 = vmul.f32 %v2457_v57, %v412_v58 }
 0x4b2   :  { %416 = vrot.lane.b32.xlu1 %v414_v59, %s2586_s21 }
 0x524   :  { %v417_v61 = vpop.permute.xlu1 %416 }
 0x525   :  { %v2828_v62 = vadd.f32 %v417_v61, %v409_v60 }
 0x527   :  { %2458 = vtanh.f32 %v2828_v62 }
 0x534   :  { %v2459_v0 = vpop.eup %2458 }
 0x535   :  { %422 = vrot.lane.b32.xlu0 %v2459_v0, %s2585_s3 }
 0x539   :  { %427 = vperm.xlu0 %2438, %v2650_v2  }
 0x53d   :  { %2439 = vset.pattern.permute.xlu0 %v2589_v44 }
 0x5a7   :  { %v423_v23 = vpop.permute.xlu0 %422 }
 0x5a8   :  { %v425_v25 = vmul.f32 %v2457_v57, %v423_v23  ;;  %v2590_v23 = vmov 4  }
 0x5aa   :  { %433 = vrot.lane.b32.xlu1 %v425_v25, %s2586_s21 }
 0x5b4   :  { %v428_v28 = vpop.permute.xlu0 %427 }
 0x5b5   :  { %vm429_vm4 = vcmp.eq.s32.totalorder %v428_v28, %v2756_v24 }
 0x61c   :  { %v434_v27 = vpop.permute.xlu1 %433 }
 0x61d   :  { %2094 = vmatmul.mubr.msk.f32.vlgmr.msra.gmra.mxu1 %vm83_vm2, %v434_v27 }
 0x61e   :  { %2097 = vmatpush3.msra.mxu1 %v2652_v3  ;;  %2128 = vmatprep.mubr.msk.f32.mxu1 %vm2583_vm0, %v2582_v1 }
 0x61f   :  { %2098 = vmatprep.subr.mxu1 %v2582_v1 }
 0x620   :  { %2099 = vmatpush3.msra.mxu1 %v2654_v4 }
 0x621   :  { %2100 = vmatprep.subr.mxu1 %v2582_v1 }
 0x622   :  { %2101 = vmatpush3.msra.mxu1 %v2659_v5 }
 0x623   :  { %2102 = vmatprep.subr.mxu1 %v2582_v1 }
 0x624   :  { %2103 = vmatpush3.msra.mxu1 %v2663_v6 }
 0x625   :  { %2104 = vmatprep.subr.mxu1 %v2582_v1 }
 0x626   :  { %2105 = vmatpush3.msra.mxu1 %v2678_v9 }
 0x627   :  { %2106 = vmatprep.subr.mxu1 %v2582_v1 }
 0x628   :  { %2107 = vmatpush3.msra.mxu1 %v2689_v11 }
 0x629   :  { %2108 = vmatprep.subr.mxu1 %v2582_v1 }
 0x62a   :  { %2109 = vmatpush3.msra.mxu1 %v2700_v13 }
 0x62b   :  { %2110 = vmatprep.subr.mxu1 %v2582_v1 }
 0x62c   :  { %2111 = vmatpush3.msra.mxu1 %v2706_v14 }
 0x62d   :  { %2112 = vmatprep.subr.mxu1 %v2582_v1 }
 0x62e   :  { %2113 = vmatpush3.msra.mxu1 %v2712_v15 }
 0x62f   :  { %2114 = vmatprep.subr.mxu1 %v2582_v1 }
 0x630   :  { %2115 = vmatpush3.msra.mxu1 %v2718_v16 }
 0x631   :  { %2116 = vmatprep.subr.mxu1 %v2582_v1 }
 0x632   :  { %2117 = vmatpush3.msra.mxu1 %v2724_v17 }
 0x633   :  { %2118 = vmatprep.subr.mxu1 %v2582_v1 }
 0x634   :  { %2119 = vmatpush3.msra.mxu1 %v2730_v18 }
 0x635   :  { %2120 = vmatprep.subr.mxu1 %v2582_v1 }
 0x636   :  { %2121 = vmatpush3.msra.mxu1 %v2737_v19 }
 0x637   :  { %2122 = vmatprep.subr.mxu1 %v2582_v1 }
 0x638   :  { %2123 = vmatpush3.msra.mxu1 %v2742_v20 }
 0x639   :  { %2124 = vmatprep.subr.mxu1 %v2582_v1 }
 0x63a   :  { %2125 = vmatpush3.msra.mxu1 %v2746_v21 }
 0x63b   :  { %2126 = vmatprep.subr.mxu1 %v2582_v1 }
 0x63c   :  { %2127 = vmatpush3.msra.mxu1 %v2750_v22 }
 0x63d   :  { %2129 = vmatmul.mubr.msk.f32.vlgmr.msra.gmra.mxu1 %vm429_vm4, %v2584_v26  ;;  %2177 = vmatprep.subr.mxu1 %v2582_v1 }
 0x63e   :  { %2178 = vmatpush3.msra.mxu1 %v2668_v7  ;;  %2185 = vmatprep.mubr.msk.f32.mxu1 %vm2583_vm0, %v2582_v1 }
 0x63f   :  { %2179 = vmatprep.subr.mxu1 %v2582_v1 }
 0x640   :  { %2180 = vmatpush3.msra.mxu1 %v2673_v8 }
 0x641   :  { %2181 = vmatprep.subr.mxu1 %v2582_v1 }
 0x642   :  { %2182 = vmatpush3.msra.mxu1 %v2684_v10 }
 0x643   :  { %2183 = vmatprep.subr.mxu1 %v2582_v1 }
 0x644   :  { %2184 = vmatpush3.msra.mxu1 %v2695_v12 }
 0x645   :  { %2188 = vmatprep.subr.mxu1 %v2582_v1 }
 0x6dd   :  { %v503_v29 = vpop.f32.mrf.mxu1 }
 0x6df   :  { %v2095_v30 = vpop.f32.mrf.mxu1 }
 0x6fd   :  { %v573_v31 = vpop.f32.mrf.mxu1 }
 0x6fe   :  { %v574_v32 = vadd.f32 %v573_v31, %v503_v29 }
 0x6ff   :  { %v2130_v33 = vpop.f32.mrf.mxu1 }
 0x700   :  { %2460 = vtanh.f32 %v574_v32  ;;  %v1764_v35 = vmul.f32 -1.442695, %v574_v32 }
 0x702   :  { %2462 = vpow2.f32 %v1764_v35 }
 0x70d   :  { %v2461_v34 = vpop.eup %2460 }
 0x70e   :  { %586 = vrot.lane.b32.xlu1 %v2461_v34, %s2585_s3 }
 0x70f   :  { %v2463_v36 = vpop.eup %2462 }
 0x710   :  { %v580_v37 = vadd.f32 1.0, %v2463_v36 }
 0x712   :  { %2464 = vrcp.f32 %v580_v37 }
 0x71f   :  { %v2465_v38 = vpop.eup %2464 }
 0x720   :  { %v584_v41 = vmul.f32 %v2465_v38, %v2828_v62 }
 0x780   :  { %v587_v39 = vpop.permute.xlu1 %586 }
 0x781   :  { %v589_v40 = vmul.f32 %v2465_v38, %v587_v39 }
 0x783   :  { %591 = vrot.lane.b32.xlu1 %v589_v40, %s2586_s21 }
 0x7f5   :  { %v592_v42 = vpop.permute.xlu1 %591 }
 0x7f6   :  { %v2884_v43 = vadd.f32 %v592_v42, %v584_v41 }
 0x7f8   :  { %2466 = vtanh.f32 %v2884_v43 }
 0x805   :  { %v2467_v45 = vpop.eup %2466 }
 0x806   :  { %597 = vrot.lane.b32.xlu0 %v2467_v45, %s2585_s3 }
 0x80a   :  { %602 = vperm.xlu0 %2439, %v2650_v2  }
 0x80e   :  { %2440 = vset.pattern.permute.xlu0 %v2590_v23 }
 0x878   :  { %v598_v46 = vpop.permute.xlu0 %597 }
 0x879   :  { %v600_v47 = vmul.f32 %v2465_v38, %v598_v46  ;;  %v2591_v46 = vmov 5  }
 0x87b   :  { %608 = vrot.lane.b32.xlu1 %v600_v47, %s2586_s21 }
 0x885   :  { %v603_v49 = vpop.permute.xlu0 %602 }
 0x886   :  { %vm604_vm5 = vcmp.eq.s32.totalorder %v603_v49, %v2756_v24 }
 0x8ed   :  { %v609_v48 = vpop.permute.xlu1 %608 }
 0x8ee   :  { %2140 = vmatmul.mubr.msk.f32.vlgmr.msra.gmra.mxu0 %vm83_vm2, %v609_v48 }
 0x8ef   :  { %2143 = vmatpush3.msra.mxu0 %v2652_v3  ;;  %2174 = vmatprep.mubr.msk.f32.mxu0 %vm2583_vm0, %v2582_v1 }
 0x8f0   :  { %2144 = vmatprep.subr.mxu0 %v2582_v1 }
 0x8f1   :  { %2145 = vmatpush3.msra.mxu0 %v2654_v4 }
 0x8f2   :  { %2146 = vmatprep.subr.mxu0 %v2582_v1 }
 0x8f3   :  { %2147 = vmatpush3.msra.mxu0 %v2659_v5 }
 0x8f4   :  { %2148 = vmatprep.subr.mxu0 %v2582_v1 }
 0x8f5   :  { %2149 = vmatpush3.msra.mxu0 %v2663_v6 }
 0x8f6   :  { %2150 = vmatprep.subr.mxu0 %v2582_v1 }
 0x8f7   :  { %2151 = vmatpush3.msra.mxu0 %v2678_v9 }
 0x8f8   :  { %2152 = vmatprep.subr.mxu0 %v2582_v1 }
 0x8f9   :  { %2153 = vmatpush3.msra.mxu0 %v2689_v11 }
 0x8fa   :  { %2154 = vmatprep.subr.mxu0 %v2582_v1 }
 0x8fb   :  { %2155 = vmatpush3.msra.mxu0 %v2700_v13 }
 0x8fc   :  { %2156 = vmatprep.subr.mxu0 %v2582_v1 }
 0x8fd   :  { %2157 = vmatpush3.msra.mxu0 %v2706_v14 }
 0x8fe   :  { %2158 = vmatprep.subr.mxu0 %v2582_v1 }
 0x8ff   :  { %2159 = vmatpush3.msra.mxu0 %v2712_v15 }
 0x900   :  { %2160 = vmatprep.subr.mxu0 %v2582_v1 }
 0x901   :  { %2161 = vmatpush3.msra.mxu0 %v2718_v16 }
 0x902   :  { %2162 = vmatprep.subr.mxu0 %v2582_v1 }
 0x903   :  { %2163 = vmatpush3.msra.mxu0 %v2724_v17 }
 0x904   :  { %2164 = vmatprep.subr.mxu0 %v2582_v1 }
 0x905   :  { %2165 = vmatpush3.msra.mxu0 %v2730_v18 }
 0x906   :  { %2166 = vmatprep.subr.mxu0 %v2582_v1 }
 0x907   :  { %2167 = vmatpush3.msra.mxu0 %v2737_v19 }
 0x908   :  { %2168 = vmatprep.subr.mxu0 %v2582_v1 }
 0x909   :  { %2169 = vmatpush3.msra.mxu0 %v2742_v20 }
 0x90a   :  { %2170 = vmatprep.subr.mxu0 %v2582_v1 }
 0x90b   :  { %2171 = vmatpush3.msra.mxu0 %v2746_v21 }
 0x90c   :  { %2172 = vmatprep.subr.mxu0 %v2582_v1 }
 0x90d   :  { %2173 = vmatpush3.msra.mxu0 %v2750_v22 }
 0x90e   :  { %2175 = vmatmul.mubr.msk.f32.vlgmr.msra.gmra.mxu0 %vm604_vm5, %v2584_v26  ;;  %2223 = vmatprep.subr.mxu0 %v2582_v1 }
 0x90f   :  { %2224 = vmatpush3.msra.mxu0 %v2668_v7  ;;  %2231 = vmatprep.mubr.msk.f32.mxu0 %vm2583_vm0, %v2582_v1 }
 0x910   :  { %2225 = vmatprep.subr.mxu0 %v2582_v1 }
 0x911   :  { %2226 = vmatpush3.msra.mxu0 %v2673_v8 }
 0x912   :  { %2227 = vmatprep.subr.mxu0 %v2582_v1 }
 0x913   :  { %2228 = vmatpush3.msra.mxu0 %v2684_v10 }
 0x914   :  { %2229 = vmatprep.subr.mxu0 %v2582_v1 }
 0x915   :  { %2230 = vmatpush3.msra.mxu0 %v2695_v12 }
 0x916   :  { %2234 = vmatprep.subr.mxu0 %v2582_v1 }
 0x9ae   :  { %v678_v50 = vpop.f32.mrf.mxu0 }
 0x9b0   :  { %v2141_v51 = vpop.f32.mrf.mxu0 }
 0x9ce   :  { %v748_v52 = vpop.f32.mrf.mxu0 }
 0x9cf   :  { %v749_v53 = vadd.f32 %v748_v52, %v678_v50 }
 0x9d0   :  { %v2176_v54 = vpop.f32.mrf.mxu0 }
 0x9d1   :  { %2468 = vtanh.f32 %v749_v53  ;;  %v1768_v56 = vmul.f32 -1.442695, %v749_v53 }
 0x9d3   :  { %2470 = vpow2.f32 %v1768_v56 }
 0x9de   :  { %v2469_v55 = vpop.eup %2468 }
 0x9df   :  { %761 = vrot.lane.b32.xlu1 %v2469_v55, %s2585_s3 }
 0x9e0   :  { %v2471_v57 = vpop.eup %2470 }
 0x9e1   :  { %v755_v58 = vadd.f32 1.0, %v2471_v57 }
 0x9e3   :  { %2472 = vrcp.f32 %v755_v58 }
 0x9f0   :  { %v2473_v59 = vpop.eup %2472 }
 0x9f1   :  { %v759_v62 = vmul.f32 %v2473_v59, %v2884_v43 }
 0xa51   :  { %v762_v60 = vpop.permute.xlu1 %761 }
 0xa52   :  { %v764_v61 = vmul.f32 %v2473_v59, %v762_v60 }
 0xa54   :  { %766 = vrot.lane.b32.xlu1 %v764_v61, %s2586_s21 }
 0xac6   :  { %v767_v63 = vpop.permute.xlu1 %766 }
 0xac7   :  { %v2940_v0 = vadd.f32 %v767_v63, %v759_v62  ;;  %v2592_v63 = vmov 6  }
 0xac9   :  { %2474 = vtanh.f32 %v2940_v0 }
 0xad6   :  { %v2475_v25 = vpop.eup %2474 }
 0xad7   :  { %772 = vrot.lane.b32.xlu0 %v2475_v25, %s2585_s3 }
 0xadb   :  { %777 = vperm.xlu0 %2440, %v2650_v2  }
 0xadf   :  { %2441 = vset.pattern.permute.xlu0 %v2591_v46  ;;  %v1477_v46 = vld [vmem:[#allocation4 + $0x8] sm:$0xff] }
 0xb49   :  { %v773_v27 = vpop.permute.xlu0 %772 }
 0xb4a   :  { %v775_v28 = vmul.f32 %v2473_v59, %v773_v27 }
 0xb4c   :  { %783 = vrot.lane.b32.xlu1 %v775_v28, %s2586_s21  ;;  %v2593_v28 = vmov 7  }
 0xb56   :  { %v778_v30 = vpop.permute.xlu0 %777 }
 0xb57   :  { %vm779_vm6 = vcmp.eq.s32.totalorder %v778_v30, %v2756_v24  ;;  %v2516_v30 = vld [vmem:[%s3199_s0] sm:$0xff] }
 0xbbe   :  { %v784_v29 = vpop.permute.xlu1 %783 }
 0xbbf   :  { %2186 = vmatmul.mubr.msk.f32.vlgmr.msra.gmra.mxu1 %vm83_vm2, %v784_v29 }
 0xbc0   :  { %2189 = vmatpush3.msra.mxu1 %v2652_v3  ;;  %2220 = vmatprep.mubr.msk.f32.mxu1 %vm2583_vm0, %v2582_v1 }
 0xbc1   :  { %2190 = vmatprep.subr.mxu1 %v2582_v1 }
 0xbc2   :  { %2191 = vmatpush3.msra.mxu1 %v2654_v4 }
 0xbc3   :  { %2192 = vmatprep.subr.mxu1 %v2582_v1 }
 0xbc4   :  { %2193 = vmatpush3.msra.mxu1 %v2659_v5 }
 0xbc5   :  { %2194 = vmatprep.subr.mxu1 %v2582_v1 }
 0xbc6   :  { %2195 = vmatpush3.msra.mxu1 %v2663_v6 }
 0xbc7   :  { %2196 = vmatprep.subr.mxu1 %v2582_v1 }
 0xbc8   :  { %2197 = vmatpush3.msra.mxu1 %v2678_v9 }
 0xbc9   :  { %2198 = vmatprep.subr.mxu1 %v2582_v1 }
 0xbca   :  { %2199 = vmatpush3.msra.mxu1 %v2689_v11 }
 0xbcb   :  { %2200 = vmatprep.subr.mxu1 %v2582_v1 }
 0xbcc   :  { %2201 = vmatpush3.msra.mxu1 %v2700_v13 }
 0xbcd   :  { %2202 = vmatprep.subr.mxu1 %v2582_v1 }
 0xbce   :  { %2203 = vmatpush3.msra.mxu1 %v2706_v14 }
 0xbcf   :  { %2204 = vmatprep.subr.mxu1 %v2582_v1 }
 0xbd0   :  { %2205 = vmatpush3.msra.mxu1 %v2712_v15 }
 0xbd1   :  { %2206 = vmatprep.subr.mxu1 %v2582_v1 }
 0xbd2   :  { %2207 = vmatpush3.msra.mxu1 %v2718_v16 }
 0xbd3   :  { %2208 = vmatprep.subr.mxu1 %v2582_v1 }
 0xbd4   :  { %2209 = vmatpush3.msra.mxu1 %v2724_v17 }
 0xbd5   :  { %2210 = vmatprep.subr.mxu1 %v2582_v1 }
 0xbd6   :  { %2211 = vmatpush3.msra.mxu1 %v2730_v18 }
 0xbd7   :  { %2212 = vmatprep.subr.mxu1 %v2582_v1 }
 0xbd8   :  { %2213 = vmatpush3.msra.mxu1 %v2737_v19 }
 0xbd9   :  { %2214 = vmatprep.subr.mxu1 %v2582_v1 }
 0xbda   :  { %2215 = vmatpush3.msra.mxu1 %v2742_v20 }
 0xbdb   :  { %2216 = vmatprep.subr.mxu1 %v2582_v1 }
 0xbdc   :  { %2217 = vmatpush3.msra.mxu1 %v2746_v21 }
 0xbdd   :  { %2218 = vmatprep.subr.mxu1 %v2582_v1 }
 0xbde   :  { %2219 = vmatpush3.msra.mxu1 %v2750_v22 }
 0xbdf   :  { %2221 = vmatmul.mubr.msk.f32.vlgmr.msra.gmra.mxu1 %vm779_vm6, %v2584_v26  ;;  %2269 = vmatprep.subr.mxu1 %v2582_v1 }
 0xbe0   :  { %2270 = vmatpush3.msra.mxu1 %v2668_v7  ;;  %2277 = vmatprep.mubr.msk.f32.mxu1 %vm2583_vm0, %v2582_v1 }
 0xbe1   :  { %2271 = vmatprep.subr.mxu1 %v2582_v1 }
 0xbe2   :  { %2272 = vmatpush3.msra.mxu1 %v2673_v8 }
 0xbe3   :  { %2273 = vmatprep.subr.mxu1 %v2582_v1 }
 0xbe4   :  { %2274 = vmatpush3.msra.mxu1 %v2684_v10 }
 0xbe5   :  { %2275 = vmatprep.subr.mxu1 %v2582_v1 }
 0xbe6   :  { %2276 = vmatpush3.msra.mxu1 %v2695_v12 }
 0xbe7   :  { %2280 = vmatprep.subr.mxu1 %v2582_v1 }
 0xc7f   :  { %v853_v31 = vpop.f32.mrf.mxu1 }
 0xc81   :  { %v2187_v32 = vpop.f32.mrf.mxu1 }
 0xc82   :  { %v1489_v32 = vld [vmem:[#allocation4 + $0x68] sm:$0xff] }
 0xc9f   :  { %v923_v33 = vpop.f32.mrf.mxu1 }
 0xca0   :  { %v924_v34 = vadd.f32 %v923_v33, %v853_v31  ;;  %v1490_v31 = vld [vmem:[#allocation4 + $0x70] sm:$0xff]  ;;  %v1488_v33 = vld [vmem:[#allocation4 + $0x60] sm:$0xff] }
 0xca1   :  { %v2222_v35 = vpop.f32.mrf.mxu1 }
 0xca2   :  { %2476 = vtanh.f32 %v924_v34  ;;  %v1772_v37 = vmul.f32 -1.442695, %v924_v34  ;;  %v1487_v34 = vld [vmem:[#allocation4 + $0x58] sm:$0xff]  ;;  %v1486_v35 = vld [vmem:[#allocation4 + $0x50] sm:$0xff] }
 0xca4   :  { %2478 = vpow2.f32 %v1772_v37  ;;  %v1485_v37 = vld [vmem:[#allocation4 + $0x48] sm:$0xff] }
 0xcaf   :  { %v2477_v36 = vpop.eup %2476 }
 0xcb0   :  { %936 = vrot.lane.b32.xlu1 %v2477_v36, %s2585_s3 }
 0xcb1   :  { %v2479_v38 = vpop.eup %2478 }
 0xcb2   :  { %v930_v39 = vadd.f32 1.0, %v2479_v38 }
 0xcb4   :  { %2480 = vrcp.f32 %v930_v39  ;;  %v1484_v39 = vld [vmem:[#allocation4 + $0x40] sm:$0xff] }
 0xcc1   :  { %v2481_v40 = vpop.eup %2480 }
 0xcc2   :  { %v934_v43 = vmul.f32 %v2481_v40, %v2940_v0 }
 0xd22   :  { %v937_v41 = vpop.permute.xlu1 %936 }
 0xd23   :  { %v939_v42 = vmul.f32 %v2481_v40, %v937_v41  ;;  %v1482_v41 = vld [vmem:[#allocation4 + $0x30] sm:$0xff] }
 0xd25   :  { %941 = vrot.lane.b32.xlu1 %v939_v42, %s2586_s21  ;;  %v1481_v42 = vld [vmem:[#allocation4 + $0x28] sm:$0xff] }
 0xd97   :  { %v942_v44 = vpop.permute.xlu1 %941 }
 0xd98   :  { %v2996_v45 = vadd.f32 %v942_v44, %v934_v43  ;;  %v1480_v43 = vld [vmem:[#allocation4 + $0x20] sm:$0xff]  ;;  %v1479_v44 = vld [vmem:[#allocation4 + $0x18] sm:$0xff] }
 0xd9a   :  { %2482 = vtanh.f32 %v2996_v45 }
 0xda7   :  { %v2483_v47 = vpop.eup %2482 }
 0xda8   :  { %947 = vrot.lane.b32.xlu0 %v2483_v47, %s2585_s3 }
 0xdac   :  { %952 = vperm.xlu0 %2441, %v2650_v2  }
 0xdb0   :  { %2442 = vset.pattern.permute.xlu0 %v2592_v63 }
 0xe1a   :  { %v948_v48 = vpop.permute.xlu0 %947 }
 0xe1b   :  { %v950_v49 = vmul.f32 %v2481_v40, %v948_v48  ;;  %v1483_v40 = vld [vmem:[#allocation4 + $0x38] sm:$0xff]  ;;  %v1476_v48 = vld [vmem:[#allocation4] sm:$0xff] }
 0xe1d   :  { %958 = vrot.lane.b32.xlu1 %v950_v49, %s2586_s21 }
 0xe27   :  { %v953_v51 = vpop.permute.xlu0 %952 }
 0xe28   :  { %vm954_vm7 = vcmp.eq.s32.totalorder %v953_v51, %v2756_v24  ;;  %v2518_v51 = vld [vmem:[#allocation2 + $0x70] sm:$0xff] }
 0xe8f   :  { %v959_v50 = vpop.permute.xlu1 %958 }
 0xe90   :  { %2232 = vmatmul.mubr.msk.f32.vlgmr.msra.gmra.mxu0 %vm83_vm2, %v959_v50  ;;  %v2517_v50 = vld [vmem:[#allocation2 + $0x78] sm:$0xff] }
 0xe91   :  { %2235 = vmatpush3.msra.mxu0 %v2652_v3  ;;  %2266 = vmatprep.mubr.msk.f32.mxu0 %vm2583_vm0, %v2582_v1 }
 0xe92   :  { %2236 = vmatprep.subr.mxu0 %v2582_v1 }
 0xe93   :  { %2237 = vmatpush3.msra.mxu0 %v2654_v4 }
 0xe94   :  { %2238 = vmatprep.subr.mxu0 %v2582_v1 }
 0xe95   :  { %2239 = vmatpush3.msra.mxu0 %v2659_v5 }
 0xe96   :  { %2240 = vmatprep.subr.mxu0 %v2582_v1 }
 0xe97   :  { %2241 = vmatpush3.msra.mxu0 %v2663_v6 }
 0xe98   :  { %2242 = vmatprep.subr.mxu0 %v2582_v1 }
 0xe99   :  { %2243 = vmatpush3.msra.mxu0 %v2678_v9 }
 0xe9a   :  { %2244 = vmatprep.subr.mxu0 %v2582_v1 }
 0xe9b   :  { %2245 = vmatpush3.msra.mxu0 %v2689_v11 }
 0xe9c   :  { %2246 = vmatprep.subr.mxu0 %v2582_v1 }
 0xe9d   :  { %2247 = vmatpush3.msra.mxu0 %v2700_v13 }
 0xe9e   :  { %2248 = vmatprep.subr.mxu0 %v2582_v1 }
 0xe9f   :  { %2249 = vmatpush3.msra.mxu0 %v2706_v14 }
 0xea0   :  { %2250 = vmatprep.subr.mxu0 %v2582_v1 }
 0xea1   :  { %2251 = vmatpush3.msra.mxu0 %v2712_v15 }
 0xea2   :  { %2252 = vmatprep.subr.mxu0 %v2582_v1 }
 0xea3   :  { %2253 = vmatpush3.msra.mxu0 %v2718_v16 }
 0xea4   :  { %2254 = vmatprep.subr.mxu0 %v2582_v1 }
 0xea5   :  { %2255 = vmatpush3.msra.mxu0 %v2724_v17 }
 0xea6   :  { %2256 = vmatprep.subr.mxu0 %v2582_v1 }
 0xea7   :  { %2257 = vmatpush3.msra.mxu0 %v2730_v18 }
 0xea8   :  { %2258 = vmatprep.subr.mxu0 %v2582_v1 }
 0xea9   :  { %2259 = vmatpush3.msra.mxu0 %v2737_v19 }
 0xeaa   :  { %2260 = vmatprep.subr.mxu0 %v2582_v1 }
 0xeab   :  { %2261 = vmatpush3.msra.mxu0 %v2742_v20 }
 0xeac   :  { %2262 = vmatprep.subr.mxu0 %v2582_v1 }
 0xead   :  { %2263 = vmatpush3.msra.mxu0 %v2746_v21 }
 0xeae   :  { %2264 = vmatprep.subr.mxu0 %v2582_v1 }
 0xeaf   :  { %2265 = vmatpush3.msra.mxu0 %v2750_v22 }
 0xeb0   :  { %2267 = vmatmul.mubr.msk.f32.vlgmr.msra.gmra.mxu0 %vm954_vm7, %v2584_v26  ;;  %2315 = vmatprep.subr.mxu0 %v2582_v1 }
 0xeb1   :  { %2316 = vmatpush3.msra.mxu0 %v2668_v7  ;;  %2323 = vmatprep.mubr.msk.f32.mxu0 %vm2583_vm0, %v2582_v1 }
 0xeb2   :  { %2317 = vmatprep.subr.mxu0 %v2582_v1 }
 0xeb3   :  { %2318 = vmatpush3.msra.mxu0 %v2673_v8 }
 0xeb4   :  { %2319 = vmatprep.subr.mxu0 %v2582_v1 }
 0xeb5   :  { %2320 = vmatpush3.msra.mxu0 %v2684_v10 }
 0xeb6   :  { %2321 = vmatprep.subr.mxu0 %v2582_v1 }
 0xeb7   :  { %2322 = vmatpush3.msra.mxu0 %v2695_v12 }
 0xeb8   :  { %2326 = vmatprep.subr.mxu0 %v2582_v1 }
 0xf50   :  { %v1028_v52 = vpop.f32.mrf.mxu0 }
 0xf52   :  { %v2233_v53 = vpop.f32.mrf.mxu0 }
 0xf53   :  { %v2520_v53 = vld [vmem:[#allocation2 + $0x60] sm:$0xff] }
 0xf70   :  { %v1098_v7 = vpop.f32.mrf.mxu0 }
 0xf71   :  { %v1099_v54 = vadd.f32 %v1098_v7, %v1028_v52  ;;  %v2519_v52 = vld [vmem:[#allocation2 + $0x68] sm:$0xff]  ;;  %v2521_v7 = vld [vmem:[#allocation2 + $0x58] sm:$0xff] }
 0xf72   :  { %v2268_v55 = vpop.f32.mrf.mxu0 }
 0xf73   :  { %2484 = vtanh.f32 %v1099_v54  ;;  %v1776_v8 = vmul.f32 -1.442695, %v1099_v54  ;;  %v2522_v54 = vld [vmem:[#allocation2 + $0x50] sm:$0xff]  ;;  %v2523_v55 = vld [vmem:[#allocation2 + $0x48] sm:$0xff] }
 0xf75   :  { %2486 = vpow2.f32 %v1776_v8  ;;  %v2525_v8 = vld [vmem:[#allocation2 + $0x38] sm:$0xff] }
 0xf80   :  { %v2485_v56 = vpop.eup %2484 }
 0xf81   :  { %1111 = vrot.lane.b32.xlu1 %v2485_v56, %s2585_s3  ;;  %v2524_v56 = vld [vmem:[#allocation2 + $0x40] sm:$0xff] }
 0xf82   :  { %v2487_v57 = vpop.eup %2486 }
 0xf83   :  { %v1105_v58 = vadd.f32 1.0, %v2487_v57  ;;  %v2526_v57 = vld [vmem:[#allocation2 + $0x30] sm:$0xff] }
 0xf85   :  { %2488 = vrcp.f32 %v1105_v58  ;;  %v2527_v58 = vld [vmem:[#allocation2 + $0x28] sm:$0xff] }
 0xf92   :  { %v2489_v10 = vpop.eup %2488 }
 0xf93   :  { %v1109_v12 = vmul.f32 %v2489_v10, %v2996_v45  ;;  %v1478_v45 = vld [vmem:[#allocation4 + $0x10] sm:$0xff] }
 0xff3   :  { %v1112_v59 = vpop.permute.xlu1 %1111 }
 0xff4   :  { %v1114_v60 = vmul.f32 %v2489_v10, %v1112_v59  ;;  %v2529_v59 = vld [vmem:[#allocation2 + $0x18] sm:$0xff] }
 0xff6   :  { %1116 = vrot.lane.b32.xlu1 %v1114_v60, %s2586_s21  ;;  %v2530_v60 = vld [vmem:[#allocation2 + $0x10] sm:$0xff] }
0x1068   :  { %v1117_v61 = vpop.permute.xlu1 %1116 }
0x1069   :  { %v3052_v62 = vadd.f32 %v1117_v61, %v1109_v12  ;;  %v2531_v12 = vld [vmem:[#allocation2 + $0x8] sm:$0xff]  ;;  %v2532_v61 = vld [vmem:[#allocation2] sm:$0xff] }
0x106b   :  { %2490 = vtanh.f32 %v3052_v62 }
0x1078   :  { %v2491_v0 = vpop.eup %2490 }
0x1079   :  { %1122 = vrot.lane.b32.xlu0 %v2491_v0, %s2585_s3 }
0x107d   :  { %1127 = vperm.xlu0 %2442, %v2650_v2  }
0x1081   :  { %2443 = vset.pattern.permute.xlu0 %v2593_v28 }
0x10eb   :  { %v1123_v23 = vpop.permute.xlu0 %1122 }
0x10ec   :  { %v1125_v25 = vmul.f32 %v2489_v10, %v1123_v23  ;;  %v2528_v10 = vld [vmem:[#allocation2 + $0x20] sm:$0xff] }
0x10ee   :  { %1133 = vrot.lane.b32.xlu1 %v1125_v25, %s2586_s21 }
0x10f8   :  { %v1128_v2 = vpop.permute.xlu0 %1127 }
0x10f9   :  { %vm1129_vm8 = vcmp.eq.s32.totalorder %v1128_v2, %v2756_v24 }
0x1160   :  { %v1134_v27 = vpop.permute.xlu1 %1133 }
0x1161   :  { %2278 = vmatmul.mubr.msk.f32.vlgmr.msra.gmra.mxu1 %vm83_vm2, %v1134_v27 }
0x1162   :  { %2281 = vmatpush3.msra.mxu1 %v2652_v3  ;;  %2312 = vmatprep.mubr.msk.f32.mxu1 %vm2583_vm0, %v2582_v1 }
0x1163   :  { %2282 = vmatprep.subr.mxu1 %v2582_v1 }
0x1164   :  { %2283 = vmatpush3.msra.mxu1 %v2654_v4 }
0x1165   :  { %2284 = vmatprep.subr.mxu1 %v2582_v1 }
0x1166   :  { %2285 = vmatpush3.msra.mxu1 %v2659_v5 }
0x1167   :  { %2286 = vmatprep.subr.mxu1 %v2582_v1 }
0x1168   :  { %2287 = vmatpush3.msra.mxu1 %v2663_v6 }
0x1169   :  { %2288 = vmatprep.subr.mxu1 %v2582_v1 }
0x116a   :  { %2289 = vmatpush3.msra.mxu1 %v2678_v9 }
0x116b   :  { %2290 = vmatprep.subr.mxu1 %v2582_v1 }
0x116c   :  { %2291 = vmatpush3.msra.mxu1 %v2689_v11 }
0x116d   :  { %2292 = vmatprep.subr.mxu1 %v2582_v1 }
0x116e   :  { %2293 = vmatpush3.msra.mxu1 %v2700_v13 }
0x116f   :  { %2294 = vmatprep.subr.mxu1 %v2582_v1 }
0x1170   :  { %2295 = vmatpush3.msra.mxu1 %v2706_v14 }
0x1171   :  { %2296 = vmatprep.subr.mxu1 %v2582_v1 }
0x1172   :  { %2297 = vmatpush3.msra.mxu1 %v2712_v15 }
0x1173   :  { %2298 = vmatprep.subr.mxu1 %v2582_v1 }
0x1174   :  { %2299 = vmatpush3.msra.mxu1 %v2718_v16 }
0x1175   :  { %2300 = vmatprep.subr.mxu1 %v2582_v1 }
0x1176   :  { %2301 = vmatpush3.msra.mxu1 %v2724_v17 }
0x1177   :  { %2302 = vmatprep.subr.mxu1 %v2582_v1 }
0x1178   :  { %2303 = vmatpush3.msra.mxu1 %v2730_v18 }
0x1179   :  { %2304 = vmatprep.subr.mxu1 %v2582_v1 }
0x117a   :  { %2305 = vmatpush3.msra.mxu1 %v2737_v19 }
0x117b   :  { %2306 = vmatprep.subr.mxu1 %v2582_v1 }
0x117c   :  { %2307 = vmatpush3.msra.mxu1 %v2742_v20 }
0x117d   :  { %2308 = vmatprep.subr.mxu1 %v2582_v1 }
0x117e   :  { %2309 = vmatpush3.msra.mxu1 %v2746_v21 }
0x117f   :  { %2310 = vmatprep.subr.mxu1 %v2582_v1 }
0x1180   :  { %2311 = vmatpush3.msra.mxu1 %v2750_v22  ;;  %v1491_v22 = vld [vmem:[#allocation4 + $0x78] sm:$0xff] }
0x1181   :  { %2313 = vmatmul.mubr.msk.f32.vlgmr.msra.gmra.mxu1 %vm1129_vm8, %v2584_v26  ;;  %2361 = vmatprep.subr.mxu1 %v2582_v1 }
0x1182   :  { %2393 = vmatprep.mubr.msk.f32.mxu1 %vm2583_vm0, %v2582_v1  ;;  %2362 = vmatpush3.msra.mxu1 %v1491_v22 }
0x1183   :  { %2363 = vmatprep.subr.mxu1 %v2582_v1 }
0x1184   :  { %2364 = vmatpush3.msra.mxu1 %v1490_v31  ;;  %v1585_v31 = vld [vmem:[%s3204_s5 + $0x8] sm:$0xff] }
0x1185   :  { %2365 = vmatprep.subr.mxu1 %v2582_v1 }
0x1186   :  { %2366 = vmatpush3.msra.mxu1 %v1489_v32  ;;  %v1584_v32 = vld [vmem:[%s3204_s5] sm:$0xff] }
0x1187   :  { %2367 = vmatprep.subr.mxu1 %v2582_v1 }
0x1188   :  { %2368 = vmatpush3.msra.mxu1 %v1488_v33 }
0x1189   :  { %2369 = vmatprep.subr.mxu1 %v2582_v1 }
0x118a   :  { %2370 = vmatpush3.msra.mxu1 %v1487_v34 }
0x118b   :  { %2371 = vmatprep.subr.mxu1 %v2582_v1 }
0x118c   :  { %2372 = vmatpush3.msra.mxu1 %v1486_v35 }
0x118d   :  { %2373 = vmatprep.subr.mxu1 %v2582_v1 }
0x118e   :  { %2374 = vmatpush3.msra.mxu1 %v1485_v37  ;;  %v1583_v37 = vld [vmem:[%s3203_s4 + $0x18] sm:$0xff] }
0x118f   :  { %2375 = vmatprep.subr.mxu1 %v2582_v1 }
0x1190   :  { %2376 = vmatpush3.msra.mxu1 %v1484_v39  ;;  %v1582_v39 = vld [vmem:[%s3203_s4 + $0x10] sm:$0xff] }
0x1191   :  { %2377 = vmatprep.subr.mxu1 %v2582_v1 }
0x1192   :  { %2378 = vmatpush3.msra.mxu1 %v1483_v40  ;;  %v1581_v40 = vld [vmem:[%s3203_s4 + $0x8] sm:$0xff] }
0x1193   :  { %2379 = vmatprep.subr.mxu1 %v2582_v1 }
0x1194   :  { %2380 = vmatpush3.msra.mxu1 %v1482_v41  ;;  %v1580_v41 = vld [vmem:[%s3203_s4] sm:$0xff] }
0x1195   :  { %2381 = vmatprep.subr.mxu1 %v2582_v1 }
0x1196   :  { %2382 = vmatpush3.msra.mxu1 %v1481_v42 }
0x1197   :  { %2383 = vmatprep.subr.mxu1 %v2582_v1 }
0x1198   :  { %2384 = vmatpush3.msra.mxu1 %v1480_v43 }
0x1199   :  { %2385 = vmatprep.subr.mxu1 %v2582_v1 }
0x119a   :  { %2386 = vmatpush3.msra.mxu1 %v1479_v44 }
0x119b   :  { %2387 = vmatprep.subr.mxu1 %v2582_v1 }
0x119c   :  { %2388 = vmatpush3.msra.mxu1 %v1478_v45 }
0x119d   :  { %2389 = vmatprep.subr.mxu1 %v2582_v1 }
0x119e   :  { %2390 = vmatpush3.msra.mxu1 %v1477_v46  ;;  %v1789_v46 = vld [vmem:[%s3205_s6] ss:$0 sm:$0xff] }
0x119f   :  { %2391 = vmatprep.subr.mxu1 %v2582_v1 }
0x11a0   :  { %2392 = vmatpush3.msra.mxu1 %v1476_v48 }
0x1221   :  { %v1203_v3 = vpop.f32.mrf.mxu1 }
0x1223   :  { %v2279_v4 = vpop.f32.mrf.mxu1 }
0x1241   :  { %v1273_v5 = vpop.f32.mrf.mxu1 }
0x1242   :  { %v1274_v6 = vadd.f32 %v1273_v5, %v1203_v3 }
0x1243   :  { %v2314_v9 = vpop.f32.mrf.mxu1 }
0x1244   :  { %2492 = vtanh.f32 %v1274_v6  ;;  %v1780_v13 = vmul.f32 -1.442695, %v1274_v6 }
0x1246   :  { %2494 = vpow2.f32 %v1780_v13 }
0x1251   :  { %v2493_v11 = vpop.eup %2492 }
0x1252   :  { %1286 = vrot.lane.b32.xlu1 %v2493_v11, %s2585_s3 }
0x1253   :  { %v2495_v14 = vpop.eup %2494 }
0x1254   :  { %v1280_v15 = vadd.f32 1.0, %v2495_v14 }
0x1256   :  { %2496 = vrcp.f32 %v1280_v15 }
0x1263   :  { %v2497_v16 = vpop.eup %2496 }
0x1264   :  { %v1284_v19 = vmul.f32 %v2497_v16, %v3052_v62 }
0x12c4   :  { %v1287_v17 = vpop.permute.xlu1 %1286 }
0x12c5   :  { %v1289_v18 = vmul.f32 %v2497_v16, %v1287_v17 }
0x12c7   :  { %1291 = vrot.lane.b32.xlu1 %v1289_v18, %s2586_s21 }
0x1339   :  { %v1292_v20 = vpop.permute.xlu1 %1291 }
0x133a   :  { %v3100_v21 = vadd.f32 %v1292_v20, %v1284_v19  ;;  %v1587_v19 = vld [vmem:[%s3204_s5 + $0x18] sm:$0xff]  ;;  %v1586_v20 = vld [vmem:[%s3204_s5 + $0x10] sm:$0xff] }
0x133c   :  { %2498 = vtanh.f32 %v3100_v21 }
0x1349   :  { %v2499_v29 = vpop.eup %2498 }
0x134a   :  { %1297 = vrot.lane.b32.xlu0 %v2499_v29, %s2585_s3 }
0x134e   :  { %1302 = vperm.xlu0 %2443, %v2516_v30  }
0x13bc   :  { %v1298_v36 = vpop.permute.xlu0 %1297 }
0x13bd   :  { %v1300_v38 = vmul.f32 %v2497_v16, %v1298_v36 }
0x13bf   :  { %1308 = vrot.lane.b32.xlu1 %v1300_v38, %s2586_s21 }
0x13c9   :  { %v1303_v47 = vpop.permute.xlu0 %1302 }
0x13ca   :  { %vm1304_vm9 = vcmp.eq.s32.totalorder %v1303_v47, %v2756_v24 }
0x13cb   :  { %2394 = vmatmul.mubr.msk.f32.vlgmr.msra.gmra.mxu1 %vm1304_vm9, %v2584_v26 }
0x1431   :  { %v1309_v49 = vpop.permute.xlu1 %1308 }
0x1432   :  { %2324 = vmatmul.mubr.msk.f32.vlgmr.msra.gmra.mxu0 %vm83_vm2, %v1309_v49 }
0x1433   :  { %2327 = vmatpush3.msra.mxu0 %v2517_v50  ;;  %2358 = vmatprep.mubr.msk.f32.mxu0 %vm2583_vm0, %v2582_v1 }
0x1434   :  { %2328 = vmatprep.subr.mxu0 %v2582_v1 }
0x1435   :  { %2329 = vmatpush3.msra.mxu0 %v2518_v51 }
0x1436   :  { %2330 = vmatprep.subr.mxu0 %v2582_v1 }
0x1437   :  { %2331 = vmatpush3.msra.mxu0 %v2519_v52 }
0x1438   :  { %2332 = vmatprep.subr.mxu0 %v2582_v1 }
0x1439   :  { %2333 = vmatpush3.msra.mxu0 %v2520_v53 }
0x143a   :  { %2334 = vmatprep.subr.mxu0 %v2582_v1 }
0x143b   :  { %2335 = vmatpush3.msra.mxu0 %v2521_v7 }
0x143c   :  { %2336 = vmatprep.subr.mxu0 %v2582_v1 }
0x143d   :  { %2337 = vmatpush3.msra.mxu0 %v2522_v54 }
0x143e   :  { %2338 = vmatprep.subr.mxu0 %v2582_v1 }
0x143f   :  { %2339 = vmatpush3.msra.mxu0 %v2523_v55 }
0x1440   :  { %2340 = vmatprep.subr.mxu0 %v2582_v1 }
0x1441   :  { %2341 = vmatpush3.msra.mxu0 %v2524_v56 }
0x1442   :  { %2342 = vmatprep.subr.mxu0 %v2582_v1 }
0x1443   :  { %2343 = vmatpush3.msra.mxu0 %v2525_v8 }
0x1444   :  { %2344 = vmatprep.subr.mxu0 %v2582_v1 }
0x1445   :  { %2345 = vmatpush3.msra.mxu0 %v2526_v57 }
0x1446   :  { %2346 = vmatprep.subr.mxu0 %v2582_v1 }
0x1447   :  { %2347 = vmatpush3.msra.mxu0 %v2527_v58 }
0x1448   :  { %2348 = vmatprep.subr.mxu0 %v2582_v1 }
0x1449   :  { %2349 = vmatpush3.msra.mxu0 %v2528_v10 }
0x144a   :  { %2350 = vmatprep.subr.mxu0 %v2582_v1 }
0x144b   :  { %2351 = vmatpush3.msra.mxu0 %v2529_v59 }
0x144c   :  { %2352 = vmatprep.subr.mxu0 %v2582_v1 }
0x144d   :  { %2353 = vmatpush3.msra.mxu0 %v2530_v60 }
0x144e   :  { %2354 = vmatprep.subr.mxu0 %v2582_v1 }
0x144f   :  { %2355 = vmatpush3.msra.mxu0 %v2531_v12 }
0x1450   :  { %2356 = vmatprep.subr.mxu0 %v2582_v1 }
0x1451   :  { %2357 = vmatpush3.msra.mxu0 %v2532_v61 }
0x1452   :  { %2359 = vmatmul.mubr.msk.f32.vlgmr.msra.gmra.mxu0 %vm1304_vm9, %v2584_v26  ;;  %2396 = vmatprep.subr.mxu0 %v2582_v1 }
0x1453   :  { %2404 = vmatprep.mubr.msk.f32.mxu0 %vm2583_vm0, %v2582_v1  ;;  %2397 = vmatpush3.msra.mxu0 %v1587_v19 }
0x1454   :  { %2398 = vmatprep.subr.mxu0 %v2582_v1 }
0x1455   :  { %2399 = vmatpush3.msra.mxu0 %v1586_v20 }
0x1456   :  { %2400 = vmatprep.subr.mxu0 %v2582_v1 }
0x1457   :  { %2401 = vmatpush3.msra.mxu0 %v1585_v31 }
0x1458   :  { %2402 = vmatprep.subr.mxu0 %v2582_v1 }
0x1459   :  { %2403 = vmatpush3.msra.mxu0 %v1584_v32 }
0x145a   :  { %2407 = vmatprep.subr.mxu0 %v2582_v1 }
0x148b   :  { %v1558_v62 = vpop.f32.mrf.mxu1 }
0x148c   :  { %v1786_v26 = vmul.f32 -1.442695, %v1558_v62 }
0x148d   :  { %v2395_v63 = vpop.f32.mrf.mxu1 }
0x14f2   :  { %v1378_v0 = vpop.f32.mrf.mxu0 }
0x14f4   :  { %v2325_v23 = vpop.f32.mrf.mxu0 }
0x1512   :  { %v1448_v25 = vpop.f32.mrf.mxu0 }
0x1513   :  { %v1449_v27 = vadd.f32 %v1448_v25, %v1378_v0 }
0x1514   :  { %v2360_v2 = vpop.f32.mrf.mxu0 }
0x1515   :  { %2500 = vtanh.f32 %v1449_v27  ;;  %v1784_v24 = vmul.f32 -1.442695, %v1449_v27 }
0x1516   :  { %2502 = vtanh.f32 %v1558_v62 }
0x1517   :  { %2504 = vpow2.f32 %v1784_v24 }
0x1518   :  { %2506 = vpow2.f32 %v1786_v26 }
0x1522   :  { %v2501_v3 = vpop.eup %2500 }
0x1523   :  { %1461 = vrot.lane.b32.xlu1 %v2501_v3, %s2585_s3  ;;  %v2503_v4 = vpop.eup %2502 }
0x1524   :  { %v2505_v5 = vpop.eup %2504 }
0x1525   :  { %v1455_v6 = vadd.f32 1.0, %v2505_v5  ;;  %v2507_v9 = vpop.eup %2506 }
0x1526   :  { %v1565_v11 = vadd.f32 1.0, %v2507_v9 }
0x1527   :  { %1570 = vrot.lane.b32.xlu1 %v2503_v4, %s2585_s3  ;;  %2508 = vrcp.f32 %v1455_v6 }
0x1528   :  { %2510 = vrcp.f32 %v1565_v11 }
0x1534   :  { %v2509_v13 = vpop.eup %2508 }
0x1535   :  { %v2511_v16 = vpop.eup %2510  ;;  %v1459_v28 = vmul.f32 %v2509_v13, %v3100_v21 }
0x1595   :  { %v1462_v14 = vpop.permute.xlu1 %1461 }
0x1596   :  { %v1464_v15 = vmul.f32 %v2509_v13, %v1462_v14 }
0x1598   :  { %1466 = vrot.lane.b32.xlu0 %v1464_v15, %s2586_s21 }
0x1599   :  { %v1571_v17 = vpop.permute.xlu1 %1570 }
0x159a   :  { %v1573_v18 = vmul.f32 %v2511_v16, %v1571_v17 }
0x159c   :  { %2512 = vtanh.f32 %v1573_v18 }
0x15a9   :  { %v2513_v22 = vpop.eup %2512 }
0x15aa   :  { %1576 = vrot.lane.b32.xlu1 %v2513_v22, %s2594_s27 }
0x160a   :  { %v1467_v29 = vpop.permute.xlu0 %1466 }
0x160b   :  { %v1469_v30 = vadd.f32 %v1467_v29, %v1459_v28 }
0x160d   :  { %2514 = vtanh.f32 %v1469_v30 }
0x161a   :  { %v2515_v33 = vpop.eup %2514 }
0x161b   :  { %1472 = vrot.lane.b32.xlu0 %v2515_v33, %s2585_s3 }
0x161c   :  { %v1577_v21 = vpop.permute.xlu1 %1576 }
0x161d   :  { %v1579_v34 = vmul.f32 %v2511_v16, %v1577_v21 }
0x161f   :  { %1589 = vrot.lane.b32.xlu1 %v1579_v34, %s2586_s21 }
0x168d   :  { %v1473_v35 = vpop.permute.xlu0 %1472 }
0x168e   :  { %v1475_v36 = vmul.f32 %v2509_v13, %v1473_v35 }
0x1690   :  { %1664 = vrot.lane.b32.xlu0 %v1475_v36, %s2586_s21 }
0x1691   :  { %v1590_v38 = vpop.permute.xlu1 %1589 }
0x1692   :  { %2405 = vmatmul.mubr.msk.f32.vlgmr.msra.gmra.mxu0 %vm83_vm2, %v1590_v38 }
0x1693   :  { %2408 = vmatpush3.msra.mxu0 %v1583_v37  ;;  %2415 = vmatprep.mubr.msk.f32.mxu0 %vm2583_vm0, %v2582_v1 }
0x1694   :  { %2409 = vmatprep.subr.mxu0 %v2582_v1 }
0x1695   :  { %2410 = vmatpush3.msra.mxu0 %v1582_v39 }
0x1696   :  { %2411 = vmatprep.subr.mxu0 %v2582_v1 }
0x1697   :  { %2412 = vmatpush3.msra.mxu0 %v1581_v40 }
0x1698   :  { %2413 = vmatprep.subr.mxu0 %v2582_v1 }
0x1699   :  { %2414 = vmatpush3.msra.mxu0 %v1580_v41 }
0x1702   :  { %v1665_v42 = vpop.permute.xlu0 %1664 }
0x1703   :  { %2416 = vmatmul.mubr.msk.f32.vlgmr.msra.gmra.mxu0 %vm83_vm2, %v1665_v42 }
0x1752   :  { %v1659_v43 = vpop.f32.mrf.mxu0 }
0x1754   :  { %v2406_v44 = vpop.f32.mrf.mxu0 }
0x17c3   :  { %v1734_v45 = vpop.f32.mrf.mxu0 }
0x17c4   :  { %v1735_v47 = vadd.f32 %v1734_v45, %v1659_v43 }
0x17c5   :  { %v2417_v48 = vpop.f32.mrf.mxu0 }
0x17c6   :  { %v1745_v49 = vadd.f32 %v1789_v46, %v1735_v47 }
0x17c8   :  { %1747 = vst.msk [vmem:[%s3206_s7] sm:$0xff] %vm1746_vm10, %v1745_v49 }
0x17c9   :  { %1752 = vsyncpa [#allocation3], 1 }
0x17ca   :  { %1753 = vsyncpa [#allocation5], 1 }

</bundles_post_ra>
